<compile_context>
chip_gen: v7x
topology: tpu7x:2x2x1
jax: 0.10.0
libtpu: 0.0.40
codegen_flags: <defaults>
</compile_context>

<pallas_src>
import functools

import jax
import jax.numpy as jnp
import numpy as np
from jax import lax
from jax.experimental import pallas as pl
from jax.experimental.pallas import tpu as pltpu

# ----- "args.criteria" style hyper-parameters (deterministic, in-script) -----
RGB_WEIGHT = 0.5
DEPTH_WEIGHT = 1.0
SDF_WEIGHT = 1000.0
FS_WEIGHT = 10.0
BK_WEIGHT = 10.0          # computed (bk_loss) but, like PyTorch, not added to total
VIT_WEIGHT = 0.0          # vit loss disabled
TRUNCATION = 0.05         # sdf_truncation
MAX_DEPTH = 8.0           # data_specs['max_depth']

N_ACC = 9                 # number of reduction terms


def _round_up(x, m):
    return ((x + m - 1) // m) * m


def _vmem_budget_bytes():
    """Generation-aware VMEM budget for tile auto-sizing (v7x has only 64 MiB)."""
    try:
        phys = int(pltpu.get_tpu_info().vmem_capacity_bytes)
    except Exception:
        phys = 64 * 1024 * 1024          # conservative (v7x-sized) fallback
    # Never plan for more than ~40% of physical VMEM, capped at 48 MiB.
    return min((phys * 2) // 5, 48 * 1024 * 1024)


def _pick_tile(n_rays, n_samples, sdf_itemsize, n_cores):
    """Largest 128-multiple lane tile that fits the VMEM budget (inputs are
    double-buffered) while still giving every core at least one tile."""
    per_lane = (2 * (8 * 4 + n_samples * 4 + n_samples * sdf_itemsize)   # dbl-buffered inputs
                + (3 * 1 + 6 * 8) * 4)                                    # accumulators
    max_tile = max(128, (_vmem_budget_bytes() // per_lane) // 128 * 128)
    per_core = _round_up(-(-n_rays // n_cores), 128)   # keep both TCs busy on v7x
    return int(max(128, min(max_tile, per_core)))


def _acc_rows(acc_ref, term):
    """Accumulate a [S, TILE] f32 term into a dense (8, TILE) accumulator via
    8-sublane group adds (no per-step cross-sublane reduction)."""
    s = term.shape[0]
    full = (s // 8) * 8
    total = None
    for g in range(0, full, 8):
        blk = term[g:g + 8, :]
        total = blk if total is None else total + blk
    if total is not None:
        acc_ref[...] += total
    if s != full:                       # ragged sample remainder (S % 8 != 0)
        acc_ref[0:s - full, :] += term[full:, :]


def _criterion_kernel(small_ref, z_ref, sdf_ref, out_ref,
                      acc_col, acc_dsum, acc_dcnt,
                      acc_nfs, acc_nbk, acc_nsdf,
                      acc_fs, acc_sdf, acc_bk,
                      *, n_rays, truncation, max_depth):
    """Partial sums of every loss reduction term over ray tiles.

    Grid = (core, tile): axis 0 is core-parallel (v7x megacore, serial on
    v5e/v6e), axis 1 is the "arbitrary" reduction over lane tiles of rays.

    Output block (per core): a (1, 8, 128) f32 row whose lanes 0..8 of sublane
    row 0 hold, in order:
      0 sum|gt_color-pred_color|  1 sum valid*|gt_d-pred_d|  2 count(valid)
      3 count(front) 4 count(back) 5 count(sdf_mask)
      6 sum front*(sdf-1)^2  7 sum sdf_mask*(z+sdf*T-d)^2  8 sum back*(sdf+1)^2
    """
    p = pl.program_id(0)
    t = pl.program_id(1)
    n_t = pl.num_programs(1)
    tile = z_ref.shape[1]

    small_accs = (acc_col, acc_dsum, acc_dcnt)
    big_accs = (acc_nfs, acc_nbk, acc_nsdf, acc_fs, acc_sdf, acc_bk)

    @pl.when(t == 0)
    def _init():
        out_ref[...] = jnp.zeros_like(out_ref)
        for r in small_accs + big_accs:
            r[...] = jnp.zeros_like(r)

    # Ragged-tail lane mask: lanes whose logical ray index >= n_rays hold
    # garbage (partial boundary DMA or a clamped duplicate block) and must not
    # contribute.  All contributions below go through boolean selects that
    # include `ok`, so garbage (even Inf/NaN) can never leak into a sum.
    start = (p * n_t + t) * tile
    lane = lax.broadcasted_iota(jnp.int32, (1, tile), 1)
    ok = (lane + start) < n_rays                               # [1, tile] bool

    # ---- per-ray terms (packed slab rows: gt_r,gt_g,gt_b,gt_d,pr_r,pr_g,pr_b,pr_d)
    small = small_ref[...]                                     # [8, tile]
    gt = small[0:4, :]
    pr = small[4:8, :]
    ad = jnp.abs(gt - pr)                                      # [4, tile]
    gt_d = gt[3:4, :]                                          # [1, tile]

    acc_col[...] += jnp.sum(jnp.where(ok, ad[0:3, :], 0.0), axis=0, keepdims=True)
    # NOTE: the depth-L1 validity threshold is >0.01 while the sdf depth_mask
    # below uses >0.0 -- both thresholds intentionally match the PyTorch module.
    valid_d = (gt_d > 0.01) & (gt_d < max_depth) & ok
    acc_dsum[...] += jnp.where(valid_d, ad[3:4, :], 0.0)
    acc_dcnt[...] += jnp.where(valid_d, 1.0, 0.0)

    # ---- per-sample [S, tile] sdf / free-space / back terms ----
    z = z_ref[...]
    sdf = sdf_ref[...].astype(jnp.float32)                     # bf16 stream -> f32
    dz = z - gt_d                                              # reused everywhere
    front_b = dz < -truncation
    back_b = dz > truncation
    dm_ok = (gt_d > 0.0) & (gt_d < max_depth) & ok             # [1, tile]
    front_m = front_b & ok
    back_m = back_b & ok
    sdf_m = jnp.logical_not(front_b | back_b) & dm_ok          # mutual exclusivity

    _acc_rows(acc_nfs, jnp.where(front_m, 1.0, 0.0))
    _acc_rows(acc_nbk, jnp.where(back_m, 1.0, 0.0))
    _acc_rows(acc_nsdf, jnp.where(sdf_m, 1.0, 0.0))
    _acc_rows(acc_fs, jnp.where(front_m, jnp.square(sdf - 1.0), 0.0))
    _acc_rows(acc_bk, jnp.where(back_m, jnp.square(sdf + 1.0), 0.0))
    _acc_rows(acc_sdf, jnp.where(sdf_m, jnp.square(dz + sdf * truncation), 0.0))

    # Cross-lane reduce + output write only once, on this core's last tile.
    @pl.when(t == n_t - 1)
    def _finalize():
        col = lax.broadcasted_iota(jnp.int32, (8, 128), 1)
        vec = jnp.zeros((8, 128), jnp.float32)
        accs = (acc_col, acc_dsum, acc_dcnt, acc_nfs, acc_nbk, acc_nsdf,
                acc_fs, acc_sdf, acc_bk)
        for k, r in enumerate(accs):
            vec = jnp.where(col == k, jnp.sum(r[...]), vec)
        out_ref[0] = vec


def criterion_loss(gt_color, pred_color, gt_depth, pred_depth, z_vals, pred_sdf,
                   *, channels_major=True, n_cores=2, tile_n=None):
    """Pallas forward of Criterion.get_loss (vit loss off, weight_depth_loss off).

    z_vals / pred_sdf are expected channels-major [S, N] (producer-emitted; no
    wrapper copy).  `channels_major=False` accepts rays-major [N, S] with a
    single fused transpose (one extra HBM pass -- avoid when possible).
    pred_sdf may be bf16 (halves its HBM bytes); z_vals should stay f32.
    The small per-ray inputs are packed into one [8, N] slab (~1/(2S) of the
    total bytes, negligible) so they travel as a single lane-dense DMA stream.
    """
    if not channels_major:
        # Fallback: one fused transpose pass per big array (still one extra
        # HBM pass; prefer a channels-major producer).
        z_vals = z_vals.T
        pred_sdf = pred_sdf.T

    S, N = z_vals.shape
    assert pred_sdf.shape == (S, N)
    f32 = jnp.float32

    # Packed per-ray slab, ordered for aligned 0:4 / 4:8 sublane halves.
    small = jnp.concatenate(
        [gt_color.reshape(N, 3).astype(f32),
         gt_depth.reshape(N, 1).astype(f32),
         pred_color.reshape(N, 3).astype(f32),
         pred_depth.reshape(N, 1).astype(f32)], axis=1).T          # [8, N]
    z_vals = z_vals.astype(f32)
    # pred_sdf keeps its dtype (bf16 ok); the kernel casts to f32 after load.

    if tile_n is None:
        tile = _pick_tile(N, S, pred_sdf.dtype.itemsize, n_cores)
    else:
        tile = max(128, min(_round_up(int(tile_n), 128), _round_up(N, 128)))

    n_blocks = -(-N // tile)
    t_per_core = -(-n_blocks // n_cores)
    grid = (n_cores, t_per_core)

    def lane_map(p, t):
        # Clamp the (at most n_cores-1) duplicate tail blocks in-bounds; their
        # contribution is zeroed by the in-kernel `ok` mask.
        return jnp.minimum(p * t_per_core + t, n_blocks - 1)

    kernel = functools.partial(_criterion_kernel, n_rays=N,
                               truncation=TRUNCATION, max_depth=MAX_DEPTH)

    partials = pl.pallas_call(
        kernel,
        out_shape=jax.ShapeDtypeStruct((n_cores, 8, 128), jnp.float32),
        grid_spec=pltpu.PrefetchScalarGridSpec(
            num_scalar_prefetch=0,
            grid=grid,
            in_specs=[
                pl.BlockSpec((8, tile), lambda p, t: (0, lane_map(p, t))),
                pl.BlockSpec((S, tile), lambda p, t: (0, lane_map(p, t))),
                pl.BlockSpec((S, tile), lambda p, t: (0, lane_map(p, t))),
            ],
            out_specs=pl.BlockSpec((1, 8, 128), lambda p, t: (p, 0, 0)),
            scratch_shapes=[pltpu.VMEM((1, tile), f32)] * 3      # color / dsum / dcnt
                          + [pltpu.VMEM((8, tile), f32)] * 6,    # nfs nbk nsdf fs sdf bk
        ),
        compiler_params=pltpu.CompilerParams(
            dimension_semantics=("parallel", "arbitrary"),
            vmem_limit_bytes=int(_vmem_budget_bytes() + (16 << 20))),
    )(small, z_vals, pred_sdf)

    sums = jnp.sum(partials[:, 0, :N_ACC], axis=0)               # combine per-core rows

    # ---- scalar glue (same algebra as the PyTorch module), guarded divides ----
    # (max(count, 1) / max(num_samples, 1) yields 0 instead of NaN for frames
    #  with no valid depth / no samples -- intentional divergence from PyTorch.)
    n_rays_f = jnp.float32(N)
    color_loss = sums[0] / (n_rays_f * 3.0)
    depth_loss = sums[1] / jnp.maximum(sums[2], 1.0)

    num_fs, num_bk, num_sdf = sums[3], sums[4], sums[5]
    num_samples = jnp.maximum(num_fs + num_bk + num_sdf, 1.0)
    fs_w = 1.0 - num_fs / num_samples
    bk_w = 1.0 - num_bk / num_samples
    sdf_w = 1.0 - num_sdf / num_samples

    n_elem_zs = n_rays_f * jnp.float32(S)
    fs_loss = (sums[6] / n_elem_zs) * fs_w
    sdf_loss = (sums[7] / n_elem_zs) * sdf_w
    bk_loss = (sums[8] / n_elem_zs) * bk_w   # returned by get_sdf_loss, not added

    loss = (RGB_WEIGHT * color_loss
            + DEPTH_WEIGHT * depth_loss
            + FS_WEIGHT * fs_loss
            + SDF_WEIGHT * sdf_loss)

    loss_dict = {
        "color_loss": color_loss,
        "depth_loss": depth_loss,
        "fs_loss": fs_loss,
        "sdf_loss": sdf_loss,
        "bk_loss": bk_loss,
        "loss": loss,
    }
    return loss, loss_dict


def _reference_loss(gt_color, pred_color, gt_depth, pred_depth, z_vals, pred_sdf):
    """Pure-JAX replica of Criterion.get_loss (vit loss off); rays-major inputs."""
    color_loss = jnp.mean(jnp.abs(gt_color - pred_color))
    valid = (gt_depth > 0.01) & (gt_depth < MAX_DEPTH)
    depth_loss = jnp.sum(jnp.where(valid, jnp.abs(gt_depth - pred_depth), 0.0)) / \
        jnp.sum(valid.astype(jnp.float32))
    depth_exp = jnp.broadcast_to(gt_depth, z_vals.shape)
    front = jnp.where(z_vals < depth_exp - TRUNCATION, 1.0, 0.0)
    back = jnp.where(z_vals > depth_exp + TRUNCATION, 1.0, 0.0)
    dmask = jnp.where((depth_exp > 0.0) & (depth_exp < MAX_DEPTH), 1.0, 0.0)
    smask = (1.0 - front) * (1.0 - back) * dmask
    nf, nb, ns = jnp.sum(front), jnp.sum(back), jnp.sum(smask)
    ntot = nf + nb + ns
    fs = jnp.mean(jnp.square(pred_sdf * front - front)) * (1.0 - nf / ntot)
    sd = jnp.mean(jnp.square((z_vals + pred_sdf * TRUNCATION) * smask
                             - depth_exp * smask)) * (1.0 - ns / ntot)
    return (RGB_WEIGHT * color_loss + DEPTH_WEIGHT * depth_loss
            + FS_WEIGHT * fs + SDF_WEIGHT * sd)


if __name__ == "__main__":
    N, S = 300, 32   # rays (post ray_mask selection, NOT a tile multiple), samples/ray
    key = jax.random.PRNGKey(0)
    k = jax.random.split(key, 7)

    gt_color = jax.random.uniform(k[0], (N, 3), jnp.float32)
    pred_color = jax.random.uniform(k[1], (N, 3), jnp.float32)
    gt_depth = jax.random.uniform(k[2], (N, 1), jnp.float32, 0.0, MAX_DEPTH)
    # a few invalid (zero-depth) rays, as in real frames
    gt_depth = jnp.where(jax.random.uniform(k[3], (N, 1)) < 0.1, 0.0, gt_depth)
    pred_depth = jax.random.uniform(k[4], (N, 1), jnp.float32, 0.0, MAX_DEPTH)

    # "Producer" emits the big per-sample arrays channels-major [S, N];
    # pred_sdf is streamed as bf16 (safe: bounded in [-1, 1]); z_vals stays f32.
    z_vals_cm = jnp.sort(
        jax.random.uniform(k[5], (S, N), jnp.float32, 0.0, MAX_DEPTH), axis=0)
    pred_sdf_cm = jax.random.uniform(
        k[6], (S, N), jnp.float32, -1.0, 1.0).astype(jnp.bfloat16)

    ref = jax.block_until_ready(_reference_loss(
        gt_color, pred_color, gt_depth, pred_depth,
        z_vals_cm.T, pred_sdf_cm.astype(jnp.float32).T))

    # 1) preferred path: channels-major inputs, auto-sized tiles, grid (2, T)
    loss1, loss_dict = criterion_loss(gt_color, pred_color, gt_depth, pred_depth,
                                      z_vals_cm, pred_sdf_cm)
    loss1 = jax.block_until_ready(loss1)
    assert np.allclose(np.asarray(loss1), np.asarray(ref), rtol=1e-4, atol=1e-5), \
        (float(loss1), float(ref))

    # 2) rays-major fallback + forced small tile: exercises the fused-transpose
    #    path, multi-step accumulation (T>1) and the clamped duplicate tail block.
    loss2, _ = criterion_loss(gt_color, pred_color, gt_depth, pred_depth,
                              z_vals_cm.T, pred_sdf_cm.T,
                              channels_major=False, tile_n=128)
    loss2 = jax.block_until_ready(loss2)
    assert np.allclose(np.asarray(loss2), np.asarray(ref), rtol=1e-4, atol=1e-5), \
        (float(loss2), float(ref))

    print("KERNEL_OK")
</pallas_src>

<mosaic_0001>
module attributes {stable_mosaic.version = 11 : i64} {
  func.func @_criterion_kernel(%arg0: i32, %arg1: i32, %arg2: memref<8x256xf32, #tpu.memory_space<vmem>>, %arg3: memref<32x256xf32, #tpu.memory_space<vmem>>, %arg4: memref<32x256xbf16, #tpu.memory_space<vmem>>, %arg5: memref<1x8x128xf32, #tpu.memory_space<vmem>>, %arg6: memref<1x256xf32, #tpu.memory_space<vmem>>, %arg7: memref<1x256xf32, #tpu.memory_space<vmem>>, %arg8: memref<1x256xf32, #tpu.memory_space<vmem>>, %arg9: memref<8x256xf32, #tpu.memory_space<vmem>>, %arg10: memref<8x256xf32, #tpu.memory_space<vmem>>, %arg11: memref<8x256xf32, #tpu.memory_space<vmem>>, %arg12: memref<8x256xf32, #tpu.memory_space<vmem>>, %arg13: memref<8x256xf32, #tpu.memory_space<vmem>>, %arg14: memref<8x256xf32, #tpu.memory_space<vmem>>) attributes {dimension_semantics = [#tpu.dimension_semantics<parallel>, #tpu.dimension_semantics<arbitrary>], iteration_bounds = array<i64: 2, 1>, scalar_prefetch = 0 : i64, scratch_operands = 9 : i64, tpu.core_type = #tpu.core_type<tc>, window_params = [{transform_indices = @transform_0, window_bounds = array<i64: 8, 256>}, {transform_indices = @transform_1, window_bounds = array<i64: 32, 256>}, {transform_indices = @transform_2, window_bounds = array<i64: 32, 256>}, {transform_indices = @transform_3, window_bounds = array<i64: 1, 8, 128>}]} {
    %c0_i32 = arith.constant 0 : i32
    %0 = arith.cmpi eq, %arg1, %c0_i32 : i32
    %1 = arith.extui %0 : i1 to i32
    %c0_i32_0 = arith.constant 0 : i32
    %2 = arith.cmpi ne, %1, %c0_i32_0 : i32
    scf.if %2 {
      %cst_67 = arith.constant 0.000000e+00 : f32
      %156 = vector.broadcast %cst_67 : f32 to vector<1x8x128xf32>
      %c0_68 = arith.constant 0 : index
      %c0_69 = arith.constant 0 : index
      %c0_70 = arith.constant 0 : index
      %157 = vector.load %arg5[%c0_68, %c0_69, %c0_70] : memref<1x8x128xf32, #tpu.memory_space<vmem>>, vector<1x8x128xf32>
      tpu.vector_store %arg5[%c0_68, %c0_69, %c0_70], %156 {strides = array<i32>} : memref<1x8x128xf32, #tpu.memory_space<vmem>>, vector<1x8x128xf32>,
      %cst_71 = arith.constant 0.000000e+00 : f32
      %158 = vector.broadcast %cst_71 : f32 to vector<1x256xf32>
      %c0_72 = arith.constant 0 : index
      %c0_73 = arith.constant 0 : index
      %159 = vector.load %arg6[%c0_72, %c0_73] : memref<1x256xf32, #tpu.memory_space<vmem>>, vector<1x256xf32>
      tpu.vector_store %arg6[%c0_72, %c0_73], %158 {strides = array<i32>} : memref<1x256xf32, #tpu.memory_space<vmem>>, vector<1x256xf32>,
      %cst_74 = arith.constant 0.000000e+00 : f32
      %160 = vector.broadcast %cst_74 : f32 to vector<1x256xf32>
      %c0_75 = arith.constant 0 : index
      %c0_76 = arith.constant 0 : index
      %161 = vector.load %arg7[%c0_75, %c0_76] : memref<1x256xf32, #tpu.memory_space<vmem>>, vector<1x256xf32>
      tpu.vector_store %arg7[%c0_75, %c0_76], %160 {strides = array<i32>} : memref<1x256xf32, #tpu.memory_space<vmem>>, vector<1x256xf32>,
      %cst_77 = arith.constant 0.000000e+00 : f32
      %162 = vector.broadcast %cst_77 : f32 to vector<1x256xf32>
      %c0_78 = arith.constant 0 : index
      %c0_79 = arith.constant 0 : index
      %163 = vector.load %arg8[%c0_78, %c0_79] : memref<1x256xf32, #tpu.memory_space<vmem>>, vector<1x256xf32>
      tpu.vector_store %arg8[%c0_78, %c0_79], %162 {strides = array<i32>} : memref<1x256xf32, #tpu.memory_space<vmem>>, vector<1x256xf32>,
      %cst_80 = arith.constant 0.000000e+00 : f32
      %164 = vector.broadcast %cst_80 : f32 to vector<8x256xf32>
      %c0_81 = arith.constant 0 : index
      %c0_82 = arith.constant 0 : index
      %165 = vector.load %arg9[%c0_81, %c0_82] : memref<8x256xf32, #tpu.memory_space<vmem>>, vector<8x256xf32>
      tpu.vector_store %arg9[%c0_81, %c0_82], %164 {strides = array<i32>} : memref<8x256xf32, #tpu.memory_space<vmem>>, vector<8x256xf32>,
      %cst_83 = arith.constant 0.000000e+00 : f32
      %166 = vector.broadcast %cst_83 : f32 to vector<8x256xf32>
      %c0_84 = arith.constant 0 : index
      %c0_85 = arith.constant 0 : index
      %167 = vector.load %arg10[%c0_84, %c0_85] : memref<8x256xf32, #tpu.memory_space<vmem>>, vector<8x256xf32>
      tpu.vector_store %arg10[%c0_84, %c0_85], %166 {strides = array<i32>} : memref<8x256xf32, #tpu.memory_space<vmem>>, vector<8x256xf32>,
      %cst_86 = arith.constant 0.000000e+00 : f32
      %168 = vector.broadcast %cst_86 : f32 to vector<8x256xf32>
      %c0_87 = arith.constant 0 : index
      %c0_88 = arith.constant 0 : index
      %169 = vector.load %arg11[%c0_87, %c0_88] : memref<8x256xf32, #tpu.memory_space<vmem>>, vector<8x256xf32>
      tpu.vector_store %arg11[%c0_87, %c0_88], %168 {strides = array<i32>} : memref<8x256xf32, #tpu.memory_space<vmem>>, vector<8x256xf32>,
      %cst_89 = arith.constant 0.000000e+00 : f32
      %170 = vector.broadcast %cst_89 : f32 to vector<8x256xf32>
      %c0_90 = arith.constant 0 : index
      %c0_91 = arith.constant 0 : index
      %171 = vector.load %arg12[%c0_90, %c0_91] : memref<8x256xf32, #tpu.memory_space<vmem>>, vector<8x256xf32>
      tpu.vector_store %arg12[%c0_90, %c0_91], %170 {strides = array<i32>} : memref<8x256xf32, #tpu.memory_space<vmem>>, vector<8x256xf32>,
      %cst_92 = arith.constant 0.000000e+00 : f32
      %172 = vector.broadcast %cst_92 : f32 to vector<8x256xf32>
      %c0_93 = arith.constant 0 : index
      %c0_94 = arith.constant 0 : index
      %173 = vector.load %arg13[%c0_93, %c0_94] : memref<8x256xf32, #tpu.memory_space<vmem>>, vector<8x256xf32>
      tpu.vector_store %arg13[%c0_93, %c0_94], %172 {strides = array<i32>} : memref<8x256xf32, #tpu.memory_space<vmem>>, vector<8x256xf32>,
      %cst_95 = arith.constant 0.000000e+00 : f32
      %174 = vector.broadcast %cst_95 : f32 to vector<8x256xf32>
      %c0_96 = arith.constant 0 : index
      %c0_97 = arith.constant 0 : index
      %175 = vector.load %arg14[%c0_96, %c0_97] : memref<8x256xf32, #tpu.memory_space<vmem>>, vector<8x256xf32>
      tpu.vector_store %arg14[%c0_96, %c0_97], %174 {strides = array<i32>} : memref<8x256xf32, #tpu.memory_space<vmem>>, vector<8x256xf32>,
    } else {
    }
    %c1_i32 = arith.constant 1 : i32
    %3 = arith.muli %arg0, %c1_i32 : i32
    %4 = arith.addi %3, %arg1 : i32
    %c256_i32 = arith.constant 256 : i32
    %5 = arith.muli %4, %c256_i32 : i32
    %6 = tpu.iota {dimensions = array<i32: 1>} : vector<1x256xi32>
    %7 = vector.broadcast %5 : i32 to vector<1x256xi32>
    %8 = arith.addi %6, %7 : vector<1x256xi32>
    %c300_i32 = arith.constant 300 : i32
    %9 = vector.broadcast %c300_i32 : i32 to vector<1x256xi32>
    %10 = arith.cmpi slt, %8, %9 : vector<1x256xi32>
    %c0 = arith.constant 0 : index
    %c0_1 = arith.constant 0 : index
    %11 = vector.load %arg2[%c0, %c0_1] : memref<8x256xf32, #tpu.memory_space<vmem>>, vector<8x256xf32>
    %12 = vector.extract_strided_slice %11 {offsets = [0, 0], sizes = [4, 256], strides = [1, 1]} : vector<8x256xf32> to vector<4x256xf32>
    %13 = vector.extract_strided_slice %11 {offsets = [4, 0], sizes = [4, 256], strides = [1, 1]} : vector<8x256xf32> to vector<4x256xf32>
    %14 = arith.subf %12, %13 : vector<4x256xf32>
    %15 = math.absf %14 : vector<4x256xf32>
    %16 = vector.extract_strided_slice %12 {offsets = [3, 0], sizes = [1, 256], strides = [1, 1]} : vector<4x256xf32> to vector<1x256xf32>
    %c0_2 = arith.constant 0 : index
    %c0_3 = arith.constant 0 : index
    %17 = vector.load %arg6[%c0_2, %c0_3] : memref<1x256xf32, #tpu.memory_space<vmem>>, vector<1x256xf32>
    %18 = vector.extract_strided_slice %15 {offsets = [0, 0], sizes = [3, 256], strides = [1, 1]} : vector<4x256xf32> to vector<3x256xf32>
    %cst = arith.constant 0.000000e+00 : f32
    %19 = vector.shape_cast %10 : vector<1x256xi1> to vector<1x256xi1>
    %20 = vector.broadcast %19 : vector<1x256xi1> to vector<3x256xi1>
    %21 = vector.broadcast %cst : f32 to vector<3x256xf32>
    %22 = arith.select %20, %18, %21 : vector<3x256xi1>, vector<3x256xf32>
    %cst_4 = arith.constant dense<0.000000e+00> : vector<256xf32>
    %23 = vector.multi_reduction <add>, %22, %cst_4 [0] : vector<3x256xf32> to vector<256xf32>
    %24 = vector.shape_cast %23 : vector<256xf32> to vector<1x256xf32>
    %25 = arith.addf %17, %24 : vector<1x256xf32>
    %c0_5 = arith.constant 0 : index
    %c0_6 = arith.constant 0 : index
    %26 = vector.load %arg6[%c0_5, %c0_6] : memref<1x256xf32, #tpu.memory_space<vmem>>, vector<1x256xf32>
    tpu.vector_store %arg6[%c0_5, %c0_6], %25 {strides = array<i32>} : memref<1x256xf32, #tpu.memory_space<vmem>>, vector<1x256xf32>,
    %cst_7 = arith.constant 0.00999999977 : f32
    %27 = vector.broadcast %cst_7 : f32 to vector<1x256xf32>
    %28 = arith.cmpf ogt, %16, %27 : vector<1x256xf32>
    %cst_8 = arith.constant 8.000000e+00 : f32
    %29 = vector.broadcast %cst_8 : f32 to vector<1x256xf32>
    %30 = arith.cmpf olt, %16, %29 : vector<1x256xf32>
    %31 = arith.andi %28, %30 : vector<1x256xi1>
    %32 = arith.andi %31, %10 : vector<1x256xi1>
    %c0_9 = arith.constant 0 : index
    %c0_10 = arith.constant 0 : index
    %33 = vector.load %arg7[%c0_9, %c0_10] : memref<1x256xf32, #tpu.memory_space<vmem>>, vector<1x256xf32>
    %34 = vector.extract_strided_slice %15 {offsets = [3, 0], sizes = [1, 256], strides = [1, 1]} : vector<4x256xf32> to vector<1x256xf32>
    %cst_11 = arith.constant 0.000000e+00 : f32
    %35 = vector.broadcast %cst_11 : f32 to vector<1x256xf32>
    %36 = arith.select %32, %34, %35 : vector<1x256xi1>, vector<1x256xf32>
    %37 = arith.addf %33, %36 : vector<1x256xf32>
    %c0_12 = arith.constant 0 : index
    %c0_13 = arith.constant 0 : index
    %38 = vector.load %arg7[%c0_12, %c0_13] : memref<1x256xf32, #tpu.memory_space<vmem>>, vector<1x256xf32>
    tpu.vector_store %arg7[%c0_12, %c0_13], %37 {strides = array<i32>} : memref<1x256xf32, #tpu.memory_space<vmem>>, vector<1x256xf32>,
    %c0_14 = arith.constant 0 : index
    %c0_15 = arith.constant 0 : index
    %39 = vector.load %arg8[%c0_14, %c0_15] : memref<1x256xf32, #tpu.memory_space<vmem>>, vector<1x256xf32>
    %cst_16 = arith.constant 1.000000e+00 : f32
    %cst_17 = arith.constant 0.000000e+00 : f32
    %40 = vector.broadcast %cst_16 : f32 to vector<1x256xf32>
    %41 = vector.broadcast %cst_17 : f32 to vector<1x256xf32>
    %42 = arith.select %32, %40, %41 : vector<1x256xi1>, vector<1x256xf32>
    %43 = arith.addf %39, %42 : vector<1x256xf32>
    %c0_18 = arith.constant 0 : index
    %c0_19 = arith.constant 0 : index
    %44 = vector.load %arg8[%c0_18, %c0_19] : memref<1x256xf32, #tpu.memory_space<vmem>>, vector<1x256xf32>
    tpu.vector_store %arg8[%c0_18, %c0_19], %43 {strides = array<i32>} : memref<1x256xf32, #tpu.memory_space<vmem>>, vector<1x256xf32>,
    %c0_20 = arith.constant 0 : index
    %c0_21 = arith.constant 0 : index
    %45 = vector.load %arg3[%c0_20, %c0_21] : memref<32x256xf32, #tpu.memory_space<vmem>>, vector<32x256xf32>
    %c0_22 = arith.constant 0 : index
    %c0_23 = arith.constant 0 : index
    %46 = vector.load %arg4[%c0_22, %c0_23] : memref<32x256xbf16, #tpu.memory_space<vmem>>, vector<32x256xbf16>
    %47 = arith.extf %46 : vector<32x256xbf16> to vector<32x256xf32>
    %48 = vector.broadcast %16 : vector<1x256xf32> to vector<32x256xf32>
    %49 = arith.subf %45, %48 : vector<32x256xf32>
    %cst_24 = arith.constant -5.000000e-02 : f32
    %50 = vector.broadcast %cst_24 : f32 to vector<32x256xf32>
    %51 = arith.cmpf olt, %49, %50 : vector<32x256xf32>
    %cst_25 = arith.constant 5.000000e-02 : f32
    %52 = vector.broadcast %cst_25 : f32 to vector<32x256xf32>
    %53 = arith.cmpf ogt, %49, %52 : vector<32x256xf32>
    %cst_26 = arith.constant 0.000000e+00 : f32
    %54 = vector.broadcast %cst_26 : f32 to vector<1x256xf32>
    %55 = arith.cmpf ogt, %16, %54 : vector<1x256xf32>
    %cst_27 = arith.constant 8.000000e+00 : f32
    %56 = vector.broadcast %cst_27 : f32 to vector<1x256xf32>
    %57 = arith.cmpf olt, %16, %56 : vector<1x256xf32>
    %58 = arith.andi %55, %57 : vector<1x256xi1>
    %59 = arith.andi %58, %10 : vector<1x256xi1>
    %60 = vector.broadcast %10 : vector<1x256xi1> to vector<32x256xi1>
    %61 = arith.andi %51, %60 : vector<32x256xi1>
    %62 = vector.broadcast %10 : vector<1x256xi1> to vector<32x256xi1>
    %63 = arith.andi %53, %62 : vector<32x256xi1>
    %64 = arith.ori %51, %53 : vector<32x256xi1>
    %cst_28 = arith.constant dense<true> : vector<32x256xi1>
    %65 = arith.xori %64, %cst_28 : vector<32x256xi1>
    %66 = vector.broadcast %59 : vector<1x256xi1> to vector<32x256xi1>
    %67 = arith.andi %65, %66 : vector<32x256xi1>
    %cst_29 = arith.constant 1.000000e+00 : f32
    %cst_30 = arith.constant 0.000000e+00 : f32
    %68 = vector.broadcast %cst_29 : f32 to vector<32x256xf32>
    %69 = vector.broadcast %cst_30 : f32 to vector<32x256xf32>
    %70 = arith.select %61, %68, %69 : vector<32x256xi1>, vector<32x256xf32>
    %71 = vector.extract_strided_slice %70 {offsets = [0, 0], sizes = [8, 256], strides = [1, 1]} : vector<32x256xf32> to vector<8x256xf32>
    %72 = vector.extract_strided_slice %70 {offsets = [8, 0], sizes = [8, 256], strides = [1, 1]} : vector<32x256xf32> to vector<8x256xf32>
    %73 = arith.addf %71, %72 : vector<8x256xf32>
    %74 = vector.extract_strided_slice %70 {offsets = [16, 0], sizes = [8, 256], strides = [1, 1]} : vector<32x256xf32> to vector<8x256xf32>
    %75 = arith.addf %73, %74 : vector<8x256xf32>
    %76 = vector.extract_strided_slice %70 {offsets = [24, 0], sizes = [8, 256], strides = [1, 1]} : vector<32x256xf32> to vector<8x256xf32>
    %77 = arith.addf %75, %76 : vector<8x256xf32>
    %c0_31 = arith.constant 0 : index
    %c0_32 = arith.constant 0 : index
    %78 = vector.load %arg9[%c0_31, %c0_32] : memref<8x256xf32, #tpu.memory_space<vmem>>, vector<8x256xf32>
    %79 = arith.addf %78, %77 : vector<8x256xf32>
    %c0_33 = arith.constant 0 : index
    %c0_34 = arith.constant 0 : index
    %80 = vector.load %arg9[%c0_33, %c0_34] : memref<8x256xf32, #tpu.memory_space<vmem>>, vector<8x256xf32>
    tpu.vector_store %arg9[%c0_33, %c0_34], %79 {strides = array<i32>} : memref<8x256xf32, #tpu.memory_space<vmem>>, vector<8x256xf32>,
    %cst_35 = arith.constant 1.000000e+00 : f32
    %cst_36 = arith.constant 0.000000e+00 : f32
    %81 = vector.broadcast %cst_35 : f32 to vector<32x256xf32>
    %82 = vector.broadcast %cst_36 : f32 to vector<32x256xf32>
    %83 = arith.select %63, %81, %82 : vector<32x256xi1>, vector<32x256xf32>
    %84 = vector.extract_strided_slice %83 {offsets = [0, 0], sizes = [8, 256], strides = [1, 1]} : vector<32x256xf32> to vector<8x256xf32>
    %85 = vector.extract_strided_slice %83 {offsets = [8, 0], sizes = [8, 256], strides = [1, 1]} : vector<32x256xf32> to vector<8x256xf32>
    %86 = arith.addf %84, %85 : vector<8x256xf32>
    %87 = vector.extract_strided_slice %83 {offsets = [16, 0], sizes = [8, 256], strides = [1, 1]} : vector<32x256xf32> to vector<8x256xf32>
    %88 = arith.addf %86, %87 : vector<8x256xf32>
    %89 = vector.extract_strided_slice %83 {offsets = [24, 0], sizes = [8, 256], strides = [1, 1]} : vector<32x256xf32> to vector<8x256xf32>
    %90 = arith.addf %88, %89 : vector<8x256xf32>
    %c0_37 = arith.constant 0 : index
    %c0_38 = arith.constant 0 : index
    %91 = vector.load %arg10[%c0_37, %c0_38] : memref<8x256xf32, #tpu.memory_space<vmem>>, vector<8x256xf32>
    %92 = arith.addf %91, %90 : vector<8x256xf32>
    %c0_39 = arith.constant 0 : index
    %c0_40 = arith.constant 0 : index
    %93 = vector.load %arg10[%c0_39, %c0_40] : memref<8x256xf32, #tpu.memory_space<vmem>>, vector<8x256xf32>
    tpu.vector_store %arg10[%c0_39, %c0_40], %92 {strides = array<i32>} : memref<8x256xf32, #tpu.memory_space<vmem>>, vector<8x256xf32>,
    %cst_41 = arith.constant 1.000000e+00 : f32
    %cst_42 = arith.constant 0.000000e+00 : f32
    %94 = vector.broadcast %cst_41 : f32 to vector<32x256xf32>
    %95 = vector.broadcast %cst_42 : f32 to vector<32x256xf32>
    %96 = arith.select %67, %94, %95 : vector<32x256xi1>, vector<32x256xf32>
    %97 = vector.extract_strided_slice %96 {offsets = [0, 0], sizes = [8, 256], strides = [1, 1]} : vector<32x256xf32> to vector<8x256xf32>
    %98 = vector.extract_strided_slice %96 {offsets = [8, 0], sizes = [8, 256], strides = [1, 1]} : vector<32x256xf32> to vector<8x256xf32>
    %99 = arith.addf %97, %98 : vector<8x256xf32>
    %100 = vector.extract_strided_slice %96 {offsets = [16, 0], sizes = [8, 256], strides = [1, 1]} : vector<32x256xf32> to vector<8x256xf32>
    %101 = arith.addf %99, %100 : vector<8x256xf32>
    %102 = vector.extract_strided_slice %96 {offsets = [24, 0], sizes = [8, 256], strides = [1, 1]} : vector<32x256xf32> to vector<8x256xf32>
    %103 = arith.addf %101, %102 : vector<8x256xf32>
    %c0_43 = arith.constant 0 : index
    %c0_44 = arith.constant 0 : index
    %104 = vector.load %arg11[%c0_43, %c0_44] : memref<8x256xf32, #tpu.memory_space<vmem>>, vector<8x256xf32>
    %105 = arith.addf %104, %103 : vector<8x256xf32>
    %c0_45 = arith.constant 0 : index
    %c0_46 = arith.constant 0 : index
    %106 = vector.load %arg11[%c0_45, %c0_46] : memref<8x256xf32, #tpu.memory_space<vmem>>, vector<8x256xf32>
    tpu.vector_store %arg11[%c0_45, %c0_46], %105 {strides = array<i32>} : memref<8x256xf32, #tpu.memory_space<vmem>>, vector<8x256xf32>,
    %cst_47 = arith.constant 1.000000e+00 : f32
    %107 = vector.broadcast %cst_47 : f32 to vector<32x256xf32>
    %108 = arith.subf %47, %107 : vector<32x256xf32>
    %109 = arith.mulf %108, %108 : vector<32x256xf32>
    %cst_48 = arith.constant 0.000000e+00 : f32
    %110 = vector.broadcast %cst_48 : f32 to vector<32x256xf32>
    %111 = arith.select %61, %109, %110 : vector<32x256xi1>, vector<32x256xf32>
    %112 = vector.extract_strided_slice %111 {offsets = [0, 0], sizes = [8, 256], strides = [1, 1]} : vector<32x256xf32> to vector<8x256xf32>
    %113 = vector.extract_strided_slice %111 {offsets = [8, 0], sizes = [8, 256], strides = [1, 1]} : vector<32x256xf32> to vector<8x256xf32>
    %114 = arith.addf %112, %113 : vector<8x256xf32>
    %115 = vector.extract_strided_slice %111 {offsets = [16, 0], sizes = [8, 256], strides = [1, 1]} : vector<32x256xf32> to vector<8x256xf32>
    %116 = arith.addf %114, %115 : vector<8x256xf32>
    %117 = vector.extract_strided_slice %111 {offsets = [24, 0], sizes = [8, 256], strides = [1, 1]} : vector<32x256xf32> to vector<8x256xf32>
    %118 = arith.addf %116, %117 : vector<8x256xf32>
    %c0_49 = arith.constant 0 : index
    %c0_50 = arith.constant 0 : index
    %119 = vector.load %arg12[%c0_49, %c0_50] : memref<8x256xf32, #tpu.memory_space<vmem>>, vector<8x256xf32>
    %120 = arith.addf %119, %118 : vector<8x256xf32>
    %c0_51 = arith.constant 0 : index
    %c0_52 = arith.constant 0 : index
    %121 = vector.load %arg12[%c0_51, %c0_52] : memref<8x256xf32, #tpu.memory_space<vmem>>, vector<8x256xf32>
    tpu.vector_store %arg12[%c0_51, %c0_52], %120 {strides = array<i32>} : memref<8x256xf32, #tpu.memory_space<vmem>>, vector<8x256xf32>,
    %cst_53 = arith.constant 1.000000e+00 : f32
    %122 = vector.broadcast %cst_53 : f32 to vector<32x256xf32>
    %123 = arith.addf %47, %122 : vector<32x256xf32>
    %124 = arith.mulf %123, %123 : vector<32x256xf32>
    %cst_54 = arith.constant 0.000000e+00 : f32
    %125 = vector.broadcast %cst_54 : f32 to vector<32x256xf32>
    %126 = arith.select %63, %124, %125 : vector<32x256xi1>, vector<32x256xf32>
    %127 = vector.extract_strided_slice %126 {offsets = [0, 0], sizes = [8, 256], strides = [1, 1]} : vector<32x256xf32> to vector<8x256xf32>
    %128 = vector.extract_strided_slice %126 {offsets = [8, 0], sizes = [8, 256], strides = [1, 1]} : vector<32x256xf32> to vector<8x256xf32>
    %129 = arith.addf %127, %128 : vector<8x256xf32>
    %130 = vector.extract_strided_slice %126 {offsets = [16, 0], sizes = [8, 256], strides = [1, 1]} : vector<32x256xf32> to vector<8x256xf32>
    %131 = arith.addf %129, %130 : vector<8x256xf32>
    %132 = vector.extract_strided_slice %126 {offsets = [24, 0], sizes = [8, 256], strides = [1, 1]} : vector<32x256xf32> to vector<8x256xf32>
    %133 = arith.addf %131, %132 : vector<8x256xf32>
    %c0_55 = arith.constant 0 : index
    %c0_56 = arith.constant 0 : index
    %134 = vector.load %arg14[%c0_55, %c0_56] : memref<8x256xf32, #tpu.memory_space<vmem>>, vector<8x256xf32>
    %135 = arith.addf %134, %133 : vector<8x256xf32>
    %c0_57 = arith.constant 0 : index
    %c0_58 = arith.constant 0 : index
    %136 = vector.load %arg14[%c0_57, %c0_58] : memref<8x256xf32, #tpu.memory_space<vmem>>, vector<8x256xf32>
    tpu.vector_store %arg14[%c0_57, %c0_58], %135 {strides = array<i32>} : memref<8x256xf32, #tpu.memory_space<vmem>>, vector<8x256xf32>,
    %cst_59 = arith.constant 5.000000e-02 : f32
    %137 = vector.broadcast %cst_59 : f32 to vector<32x256xf32>
    %138 = arith.mulf %47, %137 : vector<32x256xf32>
    %139 = arith.addf %49, %138 : vector<32x256xf32>
    %140 = arith.mulf %139, %139 : vector<32x256xf32>
    %cst_60 = arith.constant 0.000000e+00 : f32
    %141 = vector.broadcast %cst_60 : f32 to vector<32x256xf32>
    %142 = arith.select %67, %140, %141 : vector<32x256xi1>, vector<32x256xf32>
    %143 = vector.extract_strided_slice %142 {offsets = [0, 0], sizes = [8, 256], strides = [1, 1]} : vector<32x256xf32> to vector<8x256xf32>
    %144 = vector.extract_strided_slice %142 {offsets = [8, 0], sizes = [8, 256], strides = [1, 1]} : vector<32x256xf32> to vector<8x256xf32>
    %145 = arith.addf %143, %144 : vector<8x256xf32>
    %146 = vector.extract_strided_slice %142 {offsets = [16, 0], sizes = [8, 256], strides = [1, 1]} : vector<32x256xf32> to vector<8x256xf32>
    %147 = arith.addf %145, %146 : vector<8x256xf32>
    %148 = vector.extract_strided_slice %142 {offsets = [24, 0], sizes = [8, 256], strides = [1, 1]} : vector<32x256xf32> to vector<8x256xf32>
    %149 = arith.addf %147, %148 : vector<8x256xf32>
    %c0_61 = arith.constant 0 : index
    %c0_62 = arith.constant 0 : index
    %150 = vector.load %arg13[%c0_61, %c0_62] : memref<8x256xf32, #tpu.memory_space<vmem>>, vector<8x256xf32>
    %151 = arith.addf %150, %149 : vector<8x256xf32>
    %c0_63 = arith.constant 0 : index
    %c0_64 = arith.constant 0 : index
    %152 = vector.load %arg13[%c0_63, %c0_64] : memref<8x256xf32, #tpu.memory_space<vmem>>, vector<8x256xf32>
    tpu.vector_store %arg13[%c0_63, %c0_64], %151 {strides = array<i32>} : memref<8x256xf32, #tpu.memory_space<vmem>>, vector<8x256xf32>,
    %c0_i32_65 = arith.constant 0 : i32
    %153 = arith.cmpi eq, %arg1, %c0_i32_65 : i32
    %154 = arith.extui %153 : i1 to i32
    %c0_i32_66 = arith.constant 0 : i32
    %155 = arith.cmpi ne, %154, %c0_i32_66 : i32
    scf.if %155 {
      %156 = tpu.iota {dimensions = array<i32: 1>} : vector<8x128xi32>
      %cst_67 = arith.constant 0.000000e+00 : f32
      %157 = vector.broadcast %cst_67 : f32 to vector<8x128xf32>
      %c0_i32_68 = arith.constant 0 : i32
      %158 = vector.broadcast %c0_i32_68 : i32 to vector<8x128xi32>
      %159 = arith.cmpi eq, %156, %158 : vector<8x128xi32>
      %c0_69 = arith.constant 0 : index
      %c0_70 = arith.constant 0 : index
      %160 = vector.load %arg6[%c0_69, %c0_70] : memref<1x256xf32, #tpu.memory_space<vmem>>, vector<1x256xf32>
      %161 = vector.shape_cast %160 : vector<1x256xf32> to vector<1x1x256xf32>
      %cst_71 = arith.constant dense<0.000000e+00> : vector<1xf32>
      %162 = vector.multi_reduction <add>, %161, %cst_71 [1, 2] : vector<1x1x256xf32> to vector<1xf32>
      %163 = vector.shape_cast %162 : vector<1xf32> to vector<1x1x1xf32>
      %164 = vector.extract %163[0, 0, 0] : f32 from vector<1x1x1xf32>
      %165 = vector.broadcast %164 : f32 to vector<8x128xf32>
      %166 = arith.select %159, %165, %157 : vector<8x128xi1>, vector<8x128xf32>
      %c1_i32_72 = arith.constant 1 : i32
      %167 = vector.broadcast %c1_i32_72 : i32 to vector<8x128xi32>
      %168 = arith.cmpi eq, %156, %167 : vector<8x128xi32>
      %c0_73 = arith.constant 0 : index
      %c0_74 = arith.constant 0 : index
      %169 = vector.load %arg7[%c0_73, %c0_74] : memref<1x256xf32, #tpu.memory_space<vmem>>, vector<1x256xf32>
      %170 = vector.shape_cast %169 : vector<1x256xf32> to vector<1x1x256xf32>
      %cst_75 = arith.constant dense<0.000000e+00> : vector<1xf32>
      %171 = vector.multi_reduction <add>, %170, %cst_75 [1, 2] : vector<1x1x256xf32> to vector<1xf32>
      %172 = vector.shape_cast %171 : vector<1xf32> to vector<1x1x1xf32>
      %173 = vector.extract %172[0, 0, 0] : f32 from vector<1x1x1xf32>
      %174 = vector.broadcast %173 : f32 to vector<8x128xf32>
      %175 = arith.select %168, %174, %166 : vector<8x128xi1>, vector<8x128xf32>
      %c2_i32 = arith.constant 2 : i32
      %176 = vector.broadcast %c2_i32 : i32 to vector<8x128xi32>
      %177 = arith.cmpi eq, %156, %176 : vector<8x128xi32>
      %c0_76 = arith.constant 0 : index
      %c0_77 = arith.constant 0 : index
      %178 = vector.load %arg8[%c0_76, %c0_77] : memref<1x256xf32, #tpu.memory_space<vmem>>, vector<1x256xf32>
      %179 = vector.shape_cast %178 : vector<1x256xf32> to vector<1x1x256xf32>
      %cst_78 = arith.constant dense<0.000000e+00> : vector<1xf32>
      %180 = vector.multi_reduction <add>, %179, %cst_78 [1, 2] : vector<1x1x256xf32> to vector<1xf32>
      %181 = vector.shape_cast %180 : vector<1xf32> to vector<1x1x1xf32>
      %182 = vector.extract %181[0, 0, 0] : f32 from vector<1x1x1xf32>
      %183 = vector.broadcast %182 : f32 to vector<8x128xf32>
      %184 = arith.select %177, %183, %175 : vector<8x128xi1>, vector<8x128xf32>
      %c3_i32 = arith.constant 3 : i32
      %185 = vector.broadcast %c3_i32 : i32 to vector<8x128xi32>
      %186 = arith.cmpi eq, %156, %185 : vector<8x128xi32>
      %c0_79 = arith.constant 0 : index
      %c0_80 = arith.constant 0 : index
      %187 = vector.load %arg9[%c0_79, %c0_80] : memref<8x256xf32, #tpu.memory_space<vmem>>, vector<8x256xf32>
      %188 = vector.shape_cast %187 : vector<8x256xf32> to vector<1x8x256xf32>
      %cst_81 = arith.constant dense<0.000000e+00> : vector<1xf32>
      %189 = vector.multi_reduction <add>, %188, %cst_81 [1, 2] : vector<1x8x256xf32> to vector<1xf32>
      %190 = vector.shape_cast %189 : vector<1xf32> to vector<1x1x1xf32>
      %191 = vector.extract %190[0, 0, 0] : f32 from vector<1x1x1xf32>
      %192 = vector.broadcast %191 : f32 to vector<8x128xf32>
      %193 = arith.select %186, %192, %184 : vector<8x128xi1>, vector<8x128xf32>
      %c4_i32 = arith.constant 4 : i32
      %194 = vector.broadcast %c4_i32 : i32 to vector<8x128xi32>
      %195 = arith.cmpi eq, %156, %194 : vector<8x128xi32>
      %c0_82 = arith.constant 0 : index
      %c0_83 = arith.constant 0 : index
      %196 = vector.load %arg10[%c0_82, %c0_83] : memref<8x256xf32, #tpu.memory_space<vmem>>, vector<8x256xf32>
      %197 = vector.shape_cast %196 : vector<8x256xf32> to vector<1x8x256xf32>
      %cst_84 = arith.constant dense<0.000000e+00> : vector<1xf32>
      %198 = vector.multi_reduction <add>, %197, %cst_84 [1, 2] : vector<1x8x256xf32> to vector<1xf32>
      %199 = vector.shape_cast %198 : vector<1xf32> to vector<1x1x1xf32>
      %200 = vector.extract %199[0, 0, 0] : f32 from vector<1x1x1xf32>
      %201 = vector.broadcast %200 : f32 to vector<8x128xf32>
      %202 = arith.select %195, %201, %193 : vector<8x128xi1>, vector<8x128xf32>
      %c5_i32 = arith.constant 5 : i32
      %203 = vector.broadcast %c5_i32 : i32 to vector<8x128xi32>
      %204 = arith.cmpi eq, %156, %203 : vector<8x128xi32>
      %c0_85 = arith.constant 0 : index
      %c0_86 = arith.constant 0 : index
      %205 = vector.load %arg11[%c0_85, %c0_86] : memref<8x256xf32, #tpu.memory_space<vmem>>, vector<8x256xf32>
      %206 = vector.shape_cast %205 : vector<8x256xf32> to vector<1x8x256xf32>
      %cst_87 = arith.constant dense<0.000000e+00> : vector<1xf32>
      %207 = vector.multi_reduction <add>, %206, %cst_87 [1, 2] : vector<1x8x256xf32> to vector<1xf32>
      %208 = vector.shape_cast %207 : vector<1xf32> to vector<1x1x1xf32>
      %209 = vector.extract %208[0, 0, 0] : f32 from vector<1x1x1xf32>
      %210 = vector.broadcast %209 : f32 to vector<8x128xf32>
      %211 = arith.select %204, %210, %202 : vector<8x128xi1>, vector<8x128xf32>
      %c6_i32 = arith.constant 6 : i32
      %212 = vector.broadcast %c6_i32 : i32 to vector<8x128xi32>
      %213 = arith.cmpi eq, %156, %212 : vector<8x128xi32>
      %c0_88 = arith.constant 0 : index
      %c0_89 = arith.constant 0 : index
      %214 = vector.load %arg12[%c0_88, %c0_89] : memref<8x256xf32, #tpu.memory_space<vmem>>, vector<8x256xf32>
      %215 = vector.shape_cast %214 : vector<8x256xf32> to vector<1x8x256xf32>
      %cst_90 = arith.constant dense<0.000000e+00> : vector<1xf32>
      %216 = vector.multi_reduction <add>, %215, %cst_90 [1, 2] : vector<1x8x256xf32> to vector<1xf32>
      %217 = vector.shape_cast %216 : vector<1xf32> to vector<1x1x1xf32>
      %218 = vector.extract %217[0, 0, 0] : f32 from vector<1x1x1xf32>
      %219 = vector.broadcast %218 : f32 to vector<8x128xf32>
      %220 = arith.select %213, %219, %211 : vector<8x128xi1>, vector<8x128xf32>
      %c7_i32 = arith.constant 7 : i32
      %221 = vector.broadcast %c7_i32 : i32 to vector<8x128xi32>
      %222 = arith.cmpi eq, %156, %221 : vector<8x128xi32>
      %c0_91 = arith.constant 0 : index
      %c0_92 = arith.constant 0 : index
      %223 = vector.load %arg13[%c0_91, %c0_92] : memref<8x256xf32, #tpu.memory_space<vmem>>, vector<8x256xf32>
      %224 = vector.shape_cast %223 : vector<8x256xf32> to vector<1x8x256xf32>
      %cst_93 = arith.constant dense<0.000000e+00> : vector<1xf32>
      %225 = vector.multi_reduction <add>, %224, %cst_93 [1, 2] : vector<1x8x256xf32> to vector<1xf32>
      %226 = vector.shape_cast %225 : vector<1xf32> to vector<1x1x1xf32>
      %227 = vector.extract %226[0, 0, 0] : f32 from vector<1x1x1xf32>
      %228 = vector.broadcast %227 : f32 to vector<8x128xf32>
      %229 = arith.select %222, %228, %220 : vector<8x128xi1>, vector<8x128xf32>
      %c8_i32 = arith.constant 8 : i32
      %230 = vector.broadcast %c8_i32 : i32 to vector<8x128xi32>
      %231 = arith.cmpi eq, %156, %230 : vector<8x128xi32>
      %c0_94 = arith.constant 0 : index
      %c0_95 = arith.constant 0 : index
      %232 = vector.load %arg14[%c0_94, %c0_95] : memref<8x256xf32, #tpu.memory_space<vmem>>, vector<8x256xf32>
      %233 = vector.shape_cast %232 : vector<8x256xf32> to vector<1x8x256xf32>
      %cst_96 = arith.constant dense<0.000000e+00> : vector<1xf32>
      %234 = vector.multi_reduction <add>, %233, %cst_96 [1, 2] : vector<1x8x256xf32> to vector<1xf32>
      %235 = vector.shape_cast %234 : vector<1xf32> to vector<1x1x1xf32>
      %236 = vector.extract %235[0, 0, 0] : f32 from vector<1x1x1xf32>
      %237 = vector.broadcast %236 : f32 to vector<8x128xf32>
      %238 = arith.select %231, %237, %229 : vector<8x128xi1>, vector<8x128xf32>
      %c0_97 = arith.constant 0 : index
      %c0_98 = arith.constant 0 : index
      %c0_99 = arith.constant 0 : index
      %239 = vector.load %arg5[%c0_97, %c0_98, %c0_99] : memref<1x8x128xf32, #tpu.memory_space<vmem>>, vector<1x8x128xf32>
      %240 = vector.shape_cast %239 : vector<1x8x128xf32> to vector<8x128xf32>
      %241 = vector.shape_cast %238 : vector<8x128xf32> to vector<1x8x128xf32>
      tpu.vector_store %arg5[%c0_97, %c0_98, %c0_99], %241 {strides = array<i32>} : memref<1x8x128xf32, #tpu.memory_space<vmem>>, vector<1x8x128xf32>,
    } else {
    }
    return
  }
  func.func @transform_0(%arg0: i32, %arg1: i32) -> (i32, i32) {
    %c1_i32 = arith.constant 1 : i32
    %0 = arith.muli %arg0, %c1_i32 : i32
    %1 = arith.addi %0, %arg1 : i32
    %c1_i32_0 = arith.constant 1 : i32
    %2 = arith.minsi %1, %c1_i32_0 : i32
    %c0_i32 = arith.constant 0 : i32
    %c0_i32_1 = arith.constant 0 : i32
    return %c0_i32, %2 : i32, i32
  }
  func.func @transform_1(%arg0: i32, %arg1: i32) -> (i32, i32) {
    %c1_i32 = arith.constant 1 : i32
    %0 = arith.muli %arg0, %c1_i32 : i32
    %1 = arith.addi %0, %arg1 : i32
    %c1_i32_0 = arith.constant 1 : i32
    %2 = arith.minsi %1, %c1_i32_0 : i32
    %c0_i32 = arith.constant 0 : i32
    %c0_i32_1 = arith.constant 0 : i32
    return %c0_i32, %2 : i32, i32
  }
  func.func @transform_2(%arg0: i32, %arg1: i32) -> (i32, i32) {
    %c1_i32 = arith.constant 1 : i32
    %0 = arith.muli %arg0, %c1_i32 : i32
    %1 = arith.addi %0, %arg1 : i32
    %c1_i32_0 = arith.constant 1 : i32
    %2 = arith.minsi %1, %c1_i32_0 : i32
    %c0_i32 = arith.constant 0 : i32
    %c0_i32_1 = arith.constant 0 : i32
    return %c0_i32, %2 : i32, i32
  }
  func.func @transform_3(%arg0: i32, %arg1: i32) -> (i32, i32, i32) {
    %c0_i32 = arith.constant 0 : i32
    %c0_i32_0 = arith.constant 0 : i32
    %c0_i32_1 = arith.constant 0 : i32
    return %arg0, %c0_i32, %c0_i32_0 : i32, i32, i32
  }
}

</mosaic_0001>

<bundles_post_ra>
// kernel: tpu_custom_call.1
= control target key start
LH: loop header
LB: loop body
LE: loop exit
PB: predicated region body
PF: predicated region fallthrough
CT: control target
= control target key end

     0   :  { %8 = vsyncpa [#allocation12], 0  ;;  %s2412_s0 = inlined_call_operand.hbm [shape: f32[8,300], index: 0, kind: input, shape index: {}]   ;;  %s2413_s1 = inlined_call_operand.hbm [shape: f32[32,300], index: 1, kind: input, shape index: {}]   ;;  %s2414_s2 = inlined_call_operand.hbm [shape: bf16[32,300], index: 2, kind: input, shape index: {}]   ;;  %s2415_s3 = inlined_call_operand.hbm [shape: f32[2,8,128], index: 3, kind: output, shape index: {}]  }
   0x1   :  { %10 = vsyncpa [#allocation12 + $0x1], 0 }
   0x2   :  { %11 = vsyncpa [#allocation15], 0 }
   0x3   :  { %13 = vsyncpa [#allocation15 + $0x1], 0 }
   0x4   :  { %14 = vsyncpa [#allocation13], 0 }
   0x5   :  { %16 = vsyncpa [#allocation13 + $0x1], 0  ;;  %s1482_s12 = smov 0   ;;  %s1484_s13 = smov 0  }
   0x6   :  { %s1486_s14 = smov 0   ;;  %s1488_s15 = smov 0  }
   0x7   :  { %s1490_s16 = smov 0   ;;  %s1492_s17 = smov 0  }
   0x8   :  { %s1494_s18 = smov 0   ;;  %s1496_s19 = smov 0  }
   0x9   :  { %s1498_s20 = smov 0  }
   0xa LB: > { %2458 = sst [smem:[#allocation21_spill]] %s1444_s19  ;;  %s1526_s21 = sadd.s32 4294967295, %s1448_s20   ;;  %s1448_s20 = sphi %s1498_s20, %s22_s20   ;;  %s1444_s19 = sphi %s1496_s19, %s2608_s19   ;;  %s1440_s18 = sphi %s1494_s18, %s2607_s18   ;;  %s1436_s17 = sphi %s1492_s17, %s2614_s17   ;;  %s1432_s16 = sphi %s1490_s16, %s2613_s16   ;;  %s1428_s15 = sphi %s1488_s15, %s2612_s15   ;;  %s1424_s14 = sphi %s1486_s14, %s2611_s14   ;;  %s1420_s13 = sphi %s1484_s13, %s2610_s13   ;;  %s1416_s12 = sphi %s1482_s12, %s2609_s12  }
   0xb   : > { %s1095_s22 = sadd.s32 4294967294, %s1448_s20   ;;  %s34_s23 = sadd.s32 1, %s1444_s19 }
   0xc   : > { %p39_p0 = scmp.lt.s32.totalorder %s1444_s19, 1  ;;  %p36_p1 = scmp.ge.s32.totalorder %s34_s23, 2 }
   0xd   : > { %s47_s24 = sadd.s32 1, %s1436_s17  ;;  %p54_p2 = scmp.ne.s32.totalorder %s1436_s17, %s1432_s16 }
   0xe   : > { %s1533_s25 = scalar_select %p39_p0, %s1444_s19, 1 }
   0xf   : > { %s2616_s23 = smov (%p36_p1, %s34_s23), 0  ;;  %p55_p3 = scmp.eq.s32.totalorder %s1448_s20, 0 }
  0x10   : > { %2459 = sst [smem:[#allocation22_spill]] %s2616_s23  ;;  %p42_p4 = scmp.lt.s32.totalorder %s2616_s23, 1 }
  0x11   : > { %p60_p5 = scmp.ne.s32.totalorder %s1432_s16, %s1428_s15  ;;  %p1542_p6 = por %p55_p3, %p54_p2 }
  0x12   : > { %p61_p7 = scmp.eq.s32.totalorder %s1526_s21, 0  ;;  %s134_s29 = ssub.s32 %s1444_s19, %s2616_s23 }
  0x13   : > { %s2460_s26 = scalar_select %p1542_p6, 1, 0 }
  0x14   : > { %s43_s27 = scalar_select %p42_p4, %s2616_s23, 1 }
  0x15   : > { %p1548_p8 = por %p61_p7, %p60_p5  ;;  %p135_p9 = scmp.eq.s32.totalorder %s134_s29, 0 }
  0x16   : > { %s44_s30 = ssub.s32 %s1533_s25, %s43_s27  ;;  %s137_s4 = sadd.s32 1, %s1424_s14 }
  0x17   : > { %s2461_s28 = scalar_select %p1548_p8, 1, 0 }
  0x18   : > { %p45_p10 = scmp.eq.s32.totalorder %s44_s30, 0  ;;  %p147_p11 = scmp.ne.s32.totalorder %s1424_s14, %s1420_s13 }
  0x19   : > { %s1557_s5 = scalar_select %p135_p9, %s1424_s14, %s137_s4  }
  0x1a   : > { %s1560_s6 = scalar_select %p45_p10, %s1436_s17, %s47_s24  }
  0x1b   : > { %2462 = sst [smem:[#allocation23_spill]] %s1557_s5  ;;  %p148_p12 = scmp.eq.s32.totalorder %s1526_s21, 1 }
  0x1c   : > { %2463 = sst [smem:[#allocation24_spill]] %s1560_s6  ;;  %p153_p13 = scmp.ne.s32.totalorder %s1420_s13, %s1416_s12 }
  0x1d   : > { %p154_p0 = scmp.eq.s32.totalorder %s1095_s22, 1  ;;  %p1567_p1 = por %p148_p12, %p147_p11 }
  0x1e   : > { %p2418_p3 = scmp.ge.s32.totalorder %s1448_s20, 2 }
  0x1f   : > { %s2464_s7 = scalar_select %p1567_p1, 1, 0 }
  0x20   : > { %p1571_p2 = por %p154_p0, %p153_p13  ;;  %170 = sbr.rel (%p2418_p3) target bundleno = 147 (0x93), region = 16 }
  0x22   : > { %s2465_s8 = scalar_select %p1571_p2, 1, 0 }
  0x27   : > { %173 = sbr.rel (!%p1542_p6) target bundleno = 73 (0x49), region = 20  ;;  %s174_s9 = sand.u32 (%p1542_p6), 1, %s1436_s17  }
  0x28   : > { %s1099_s10 = sshll.u32 (%p1542_p6), %s1533_s25, 1  ;;  %s1098_s11 = sshll.u32 (%p1542_p6), %s174_s9, 4 }
  0x29   : > { %s183_s15 = ssub.s32 (%p1542_p6), 3, %s1099_s10  ;;  %s1585_s27 = scalar_lea.sflag (%p1542_p6), [#allocation12], %s174_s9 }
  0x2a   : > { %p184_p4 = scmp.lt.s32.totalorder (%p1542_p6), %s183_s15, 2  ;;  %s178_s29 = scalar_lea.vmem (%p1542_p6), [#allocation11], %s1098_s11 }
  0x2e   : > { %s2618_s15 = smov (!%p184_p4, %s183_s15), 2 }
  0x2f   : > { %s1582_s22 = sshll.u32 %s2618_s15, 7 }
  0x30   : > { %s188_s24 = ssub.s32 256, %s1582_s22 }
  0x31   : > { %189 = vsyncadd %s1585_s27, %s188_s24  ;;  %p1101_p5 = scmp.ne.s32.totalorder %s1582_s22, 0  ;;  %s1139_s30 = sshll.u32 %s1533_s25, 8 }
  0x32   : > { %s1593_s10 = scalar_lea.hbm %s2412_s0, %s1139_s30  ;;  %s195_s9 = sshll.u32 %s178_s29, 4  ;;  %s196_s9 = int_to_ptr.vmem [resolvable:$true] %s195_s9 }
  0x33   : > { %s1254_s15 = scalar_lea.hbm %s1593_s10, %s1582_s22  ;;  %s1258_s19 = scalar_lea.hbm %s2412_s0, 384 }
  0x34   : > { %p1255_p7 = scmp.ne.s32.totalorder %s1593_s10, %s1254_s15  ;;  %p1259_p11 = scmp.lt.u32.totalorder %s1593_s10, %s2412_s0 }
  0x35   : > { %p1260_p12 = scmp.lt.u32.totalorder %s1258_s19, %s1254_s15  ;;  %p1262_p0 = scmp.lt.u32.totalorder %s1254_s15, %s1593_s10 }
  0x36   : > { %p1256_p9 = pnand %p1255_p7, %p1101_p5 }
  0x37   : > { %p1261_p13 = por %p1260_p12, %p1259_p11 }
  0x38   : > { %p1257_p10 = pneg %p1256_p9 }
  0x39   : > { %p1263_p4 = por %p1262_p0, %p1261_p13 }
  0x3b   : > { %p1264_p3 = pnand %p1263_p4, %p1257_p10 }
  0x3d   : > { %1267 = shalt.err (!%p1264_p3)
}
  0x3e   : > { %s1268_s23 = scalar_lea.vmem %s196_s9, %s1582_s22  ;;  %s1450_s29 = smov [#allocation11]  }
  0x3f   : > { %p1269_p2 = scmp.ne.s32.totalorder %s196_s9, %s1268_s23  ;;  %s1272_s30 = sshll.u32 %s1450_s29, 4  ;;  %s1273_s30 = int_to_ptr.vmem [resolvable:$false] %s1272_s30 }
  0x40   : > { %s1274_s4 = scalar_lea.vmem %s1273_s30, 512  ;;  %p1275_p1 = scmp.lt.s32.totalorder %s196_s9, %s1273_s30 }
  0x41   : > { %p1270_p7 = pnand %p1269_p2, %p1101_p5  ;;  %p1276_p8 = scmp.lt.s32.totalorder %s1274_s4, %s1268_s23 }
  0x43   : > { %p1271_p9 = pneg %p1270_p7  ;;  %p1277_p6 = por %p1276_p8, %p1275_p1 }
  0x45   : > { %p1278_p11 = pnand %p1277_p6, %p1271_p9 }
  0x47   : > { %1281 = shalt.err (!%p1278_p11)
}
  0x48   : > { %198 = dma.hbm_to_vmem [thread:$0]  (%p1101_p5), %s1593_s10, %s1582_s22, %s196_s9, %s1585_s27  }
  0x49 PF: > { %p2466_p3 = scmp.ne.s32.totalorder %s2460_s26, 0 }
  0x4a   : > { %s202_s19 = sand.u32 (%p2466_p3), 1, %s1448_s20   ;;  %s204_s5 = sand.u32 (%p2466_p3), 1, %s1436_s17  }
  0x4b   : > { %201 = sbr.rel (!%p2466_p3) target bundleno = 110 (0x6e), region = 24  ;;  %s1105_s6 = sshll.u32 (%p2466_p3), %s204_s5, 6 }
  0x4c   : > { %s1106_s15 = sshll.u32 (%p2466_p3), %s1533_s25, 1  ;;  %s1627_s27 = scalar_lea.sflag (%p2466_p3), [#allocation15], %s202_s19 }
  0x4d   : > { %s211_s11 = ssub.s32 (%p2466_p3), 3, %s1106_s15  ;;  %s206_s10 = scalar_lea.vmem (%p2466_p3), [#allocation14], %s1105_s6 }
  0x4e   : > { %p212_p6 = scmp.lt.s32.totalorder (%p2466_p3), %s211_s11, 2 }
  0x52   : > { %s2620_s11 = smov (!%p212_p6, %s211_s11), 2 }
  0x53   : > { %s1624_s24 = sshll.u32 %s2620_s11, 9 }
  0x54   : > { %s216_s22 = ssub.s32 1024, %s1624_s24 }
  0x55   : > { %217 = vsyncadd %s1627_s27, %s216_s22  ;;  %p1108_p8 = scmp.ne.s32.totalorder %s1624_s24, 0  ;;  %s1140_s9 = sshll.u32 %s1533_s25, 8 }
  0x56   : > { %s1635_s30 = scalar_lea.hbm %s2413_s1, %s1140_s9  ;;  %s1110_s4 = sshll.u32 %s2620_s11, 3 }
  0x57   : > { %s223_s19 = sshll.u32 %s206_s10, 4  ;;  %s1282_s5 = scalar_lea.hbm %s1635_s30, %s1624_s24  ;;  %s1638_s19 = int_to_ptr.vmem [resolvable:$true] %s223_s19 }
  0x58   : > { %p1283_p1 = scmp.ne.s32.totalorder %s1635_s30, %s1282_s5  ;;  %s1286_s22 = scalar_lea.hbm %s2413_s1, 1536 }
  0x59   : > { %p1287_p10 = scmp.lt.u32.totalorder %s1635_s30, %s2413_s1  ;;  %p1288_p12 = scmp.lt.u32.totalorder %s1286_s22, %s1282_s5 }
  0x5a   : > { %p1284_p2 = pnand %p1283_p1, %p1108_p8  ;;  %p1290_p0 = scmp.lt.u32.totalorder %s1282_s5, %s1635_s30 }
  0x5b   : > { %p1289_p13 = por %p1288_p12, %p1287_p10 }
  0x5c   : > { %p1285_p5 = pneg %p1284_p2 }
  0x5d   : > { %p1291_p4 = por %p1290_p0, %p1289_p13 }
  0x5f   : > { %p1292_p7 = pnand %p1291_p4, %p1285_p5 }
  0x61   : > { %1295 = shalt.err (!%p1292_p7)
}
  0x62   : > { %s1296_s10 = scalar_lea.vmem %s1638_s19, %s1624_s24  ;;  %s1451_s29 = smov [#allocation14]  }
  0x63   : > { %p1297_p9 = scmp.ne.s32.totalorder %s1638_s19, %s1296_s10  ;;  %s1300_s6 = sshll.u32 %s1451_s29, 4  ;;  %s1301_s6 = int_to_ptr.vmem [resolvable:$false] %s1300_s6 }
  0x64   : > { %s1302_s15 = scalar_lea.vmem %s1301_s6, 2048  ;;  %p1303_p6 = scmp.lt.s32.totalorder %s1638_s19, %s1301_s6 }
  0x65   : > { %p1298_p11 = pnand %p1297_p9, %p1108_p8  ;;  %p1304_p1 = scmp.lt.s32.totalorder %s1302_s15, %s1296_s10 }
  0x67   : > { %p1299_p3 = pneg %p1298_p11  ;;  %p1305_p2 = por %p1304_p1, %p1303_p6 }
  0x69   : > { %p1306_p10 = pnand %p1305_p2, %p1299_p3 }
  0x6b   : > { %1309 = shalt.err (!%p1306_p10)
}
  0x6c   : > { %s1452_s5 = smov 384   ;;  %s1453_s22 = smov 256  }
  0x6d   : > { %229 = dma.hbm_to_vmem [thread:$0]  (%p1108_p8), %s1635_s30, %s1624_s24, %s1638_s19, %s1627_s27, %s1452_s5, %s1453_s22, %s1110_s4  }
  0x6e PF: > { %p2467_p5 = scmp.ne.s32.totalorder %s2460_s26, 0 }
  0x6f   : > { %s233_s23 = sand.u32 (%p2467_p5), 1, %s1448_s20   ;;  %s235_s9 = sand.u32 (%p2467_p5), 1, %s1436_s17  }
  0x70   : > { %232 = sbr.rel (!%p2467_p5) target bundleno = 147 (0x93), region = 28  ;;  %s1113_s10 = sshll.u32 (%p2467_p5), %s235_s9, 5 }
  0x71   : > { %s1114_s29 = sshll.u32 (%p2467_p5), %s1533_s25, 1  ;;  %s1678_s24 = scalar_lea.sflag (%p2467_p5), [#allocation15], %s233_s23 }
  0x72   : > { %s242_s6 = ssub.s32 (%p2467_p5), 3, %s1114_s29  ;;  %s237_s26 = scalar_lea.vmem (%p2467_p5), [#allocation16], %s1113_s10 }
  0x73   : > { %p243_p12 = scmp.lt.s32.totalorder (%p2467_p5), %s242_s6, 2 }
  0x77   : > { %s2622_s6 = smov (!%p243_p12, %s242_s6), 2 }
  0x78   : > { %s1675_s15 = sshll.u32 %s2622_s6, 8 }
  0x79   : > { %s247_s11 = ssub.s32 512, %s1675_s15 }
  0x7a   : > { %248 = vsyncadd %s1678_s24, %s247_s11  ;;  %p1116_p8 = scmp.ne.s32.totalorder %s1675_s15, 0  ;;  %s1143_s27 = sshll.u32 %s1533_s25, 7 }
  0x7b   : > { %s1686_s19 = scalar_lea.hbm %s2414_s2, %s1143_s27  ;;  %s1118_s5 = sshll.u32 %s2622_s6, 2 }
  0x7c   : > { %s254_s22 = sshll.u32 %s237_s26, 4  ;;  %s1310_s23 = scalar_lea.hbm %s1686_s19, %s1675_s15  ;;  %s1689_s22 = int_to_ptr.vmem [resolvable:$true] %s254_s22 }
  0x7d   : > { %p1311_p13 = scmp.ne.s32.totalorder %s1686_s19, %s1310_s23  ;;  %s1314_s10 = scalar_lea.hbm %s2414_s2, 768 }
  0x7e   : > { %p1315_p7 = scmp.lt.u32.totalorder %s1686_s19, %s2414_s2  ;;  %p1316_p9 = scmp.lt.u32.totalorder %s1314_s10, %s1310_s23 }
  0x7f   : > { %p1312_p0 = pnand %p1311_p13, %p1116_p8  ;;  %p1318_p3 = scmp.lt.u32.totalorder %s1310_s23, %s1686_s19 }
  0x80   : > { %p1317_p11 = por %p1316_p9, %p1315_p7 }
  0x81   : > { %p1313_p4 = pneg %p1312_p0 }
  0x82   : > { %p1319_p6 = por %p1318_p3, %p1317_p11 }
  0x84   : > { %p1320_p1 = pnand %p1319_p6, %p1313_p4 }
  0x86   : > { %1323 = shalt.err (!%p1320_p1)
}
  0x87   : > { %s1324_s26 = scalar_lea.vmem %s1689_s22, %s1675_s15  ;;  %s1454_s27 = smov [#allocation16]  }
  0x88   : > { %p1325_p2 = scmp.ne.s32.totalorder %s1689_s22, %s1324_s26  ;;  %s1328_s30 = sshll.u32 %s1454_s27, 4  ;;  %s1329_s30 = int_to_ptr.vmem [resolvable:$false] %s1328_s30 }
  0x89   : > { %s1330_s4 = scalar_lea.vmem %s1329_s30, 1024  ;;  %p1331_p12 = scmp.lt.s32.totalorder %s1689_s22, %s1329_s30 }
  0x8a   : > { %p1326_p10 = pnand %p1325_p2, %p1116_p8  ;;  %p1332_p13 = scmp.lt.s32.totalorder %s1330_s4, %s1324_s26 }
  0x8c   : > { %p1327_p5 = pneg %p1326_p10  ;;  %p1333_p0 = por %p1332_p13, %p1331_p12 }
  0x8e   : > { %p1334_p7 = pnand %p1333_p0, %p1327_p5 }
  0x90   : > { %1337 = shalt.err (!%p1334_p7)
}
  0x91   : > { %s1455_s23 = smov 192   ;;  %s1456_s9 = smov 128  }
  0x92   : > { %260 = dma.hbm_to_vmem [thread:$0]  (%p1116_p8), %s1686_s19, %s1675_s15, %s1689_s22, %s1678_s24, %s1455_s23, %s1456_s9, %s1118_s5  }
  0x93 PF: > { %p1121_p4 = scmp.ge.s32.totalorder %s1448_s20, 1  ;;  %p262_p9 = scmp.lt.s32.totalorder %s1448_s20, 3 }
  0x95   : > { %p263_p11 = pnand %p1121_p4, %p262_p9 }
  0x97   : > { %266 = sbr.rel (%p263_p11) target bundleno = 477 (0x1dd), region = 32 }
  0x9e   : > { %s1721_s25 = sand.u32 1, %s1432_s16   ;;  %p2468_p3 = scmp.ne.s32.totalorder %s2461_s28, 0 }
  0x9f   : > { %s1122_s10 = sshll.u32 %s1721_s25, 4  ;;  %s269_s29 = scalar_lea.sflag [#allocation12], %s1721_s25 }
  0xa0   : > { %s272_s11 = scalar_lea.vmem [#allocation11], %s1122_s10 }
  0xa1   : > { %1403 = dma.done.wait (%p2468_p3), %s269_s29, 256  }
  0xa2   : > { %1405 = vsyncadd (%p2468_p3), %s269_s29, 4294967040  ;;  %s277_s6 = sand.u32 1, %s1526_s21   ;;  %s1123_s15 = sshll.u32 %s1721_s25, 6 }
  0xa3   : > { %s278_s24 = scalar_lea.sflag [#allocation15], %s277_s6  ;;  %s1731_s19 = scalar_lea.vmem [#allocation14], %s1123_s15 }
  0xa4   : > { %1407 = dma.done.wait (%p2468_p3), %s278_s24, 1536  }
  0xa5   : > { %1409 = vsyncadd (%p2468_p3), %s278_s24, 4294965760  ;;  %v352_v0 = vlaneseq  ;;  %s1126_s5 = sshll.u32 %s1440_s18, 8  ;;  %v1457_v1 = vmov 1966171168   ;;  %v2451_v8 = vmov 0.0   ;;  %v1761_v13 = vld [vmem:[%s272_s11] sm:$0xff] }
  0xa6   : > { %v419_v2 = vunpack.c.l.s4 %v1457_v1  ;;  %v376_v5 = vstv %s1126_s5  ;;  %v1763_v14 = vld [vmem:[%s272_s11 + $0x8] sm:$0xff]  ;;  %vm400_vm1 = vcmask 1042432   ;;  %v497_v16 = vld [vmem:[%s1731_s19] sm:$0xff]  ;;  %v499_v20 = vld [vmem:[%s1731_s19 + $0x10] sm:$0xff]  ;;  %vm439_vm6 = vcmp.gt.f32.partialorder %v1761_v13, 0.01 }
  0xa7   : > { %vm1738_vm0 = vcmp.lt.s32.totalorder %v352_v0, 256  ;;  %v1742_v4 = vand.u32 127, %v352_v0  ;;  %v422_v7 = vshrl.u32 %v352_v0, 7  ;;  %v386_v18 = vrot.slane %v1763_v14, 4  ;;  %v498_v19 = vld [vmem:[%s1731_s19 + $0x8] sm:$0xff]  ;;  %v500_v21 = vld [vmem:[%s1731_s19 + $0x18] sm:$0xff] }
  0xa8   : > { %v420_v6 = vunpack.c.0.s8 %v419_v2  ;;  %356 = vst.msk [vmem:[#allocation2] sm:$0x3] %vm1738_vm0, %v2451_v8  ;;  %357 = vst.msk [vmem:[#allocation3] sm:$0x3] %vm1738_vm0, %v2451_v8  ;;  %vm440_vm3 = vcmp.gt.f32.partialorder %v1763_v14, 0.01 }
  0xa9   : > { %2471 = vst [vmem:[#allocation25_spill] sm:$0xff] %v1742_v4  ;;  %358 = vst.msk [vmem:[#allocation4] sm:$0x3] %vm1738_vm0, %v2451_v8  ;;  %v375_v9 = vadd.s32 128, %v1742_v4  ;;  %v1754_v10 = vsub.s32 3, %v422_v7  ;;  %v1757_v11 = vadd.s32 %v376_v5, %v1742_v4  ;;  %v1768_v17 = vsub.s32 0, %v422_v7 }
  0xaa   : > { %v1765_v15 = vsub.s32 %v420_v6, %v422_v7  ;;  %vm2422_vm4 = vcmp.lt.f32.partialorder %v1763_v14, 8.0  ;;  %v1784_v24 = vsub.s32 1, %v422_v7  ;;  %v390_v25 = vsub.f32 %v1763_v14, %v386_v18  ;;  %v501_v27 = vld [vmem:[%s1731_s19 + $0x20] sm:$0xff]  ;;  %v502_v28 = vld [vmem:[%s1731_s19 + $0x28] sm:$0xff]  ;;  %v503_v31 = vld [vmem:[%s1731_s19 + $0x30] sm:$0xff]  ;;  %s1124_s21 = sshll.u32 %s1721_s25, 5 }
  0xab   : > { %v1759_v12 = vadd.s32 %v376_v5, %v375_v9  ;;  %vm444_vm5 = vmand %vm440_vm3, %vm2422_vm4  ;;  %v520_v22 = vrot.slane %v1761_v13, %v1754_v10  ;;  %v524_v23 = vrot.slane %v1763_v14, %v1754_v10  ;;  %vm2442_vm7 = vcmp.lt.s32.totalorder %v1757_v11, 300  ;;  %v504_v32 = vld [vmem:[%s1731_s19 + $0x38] sm:$0xff]  ;;  %s290_s28 = scalar_lea.vmem [#allocation16], %s1124_s21  ;;  %s320_s9 = sand.u32 1, %s1420_s13  }
  0xac   : > { %v385_v29 = vrot.slane %v1761_v13, 4  ;;  %vm2426_vm9 = vcmp.lt.f32.partialorder %v1761_v13, 8.0  ;;  %v392_v36 = vand.u32 2147483647, %v390_v25  ;;  %v2476_v45 = vmov 0  ;;  %s1125_s10 = sshll.u32 %s320_s9, 3 }
  0xad   : > { %vm2433_vm2 = vcmp.lt.s32.totalorder %v1759_v12, 300  ;;  %v1803_v33 = vsub.f32 %v497_v16, %v520_v22  ;;  %v1805_v34 = vsub.f32 %v498_v19, %v524_v23  ;;  %v1807_v35 = vsub.f32 %v499_v20, %v520_v22  ;;  %vm443_vm10 = vmand %vm439_vm6, %vm2426_vm9  ;;  %s1136_s11 = sshll.u32 %s1440_s18, 7  ;;  %s322_s6 = scalar_lea.vmem [#allocation17], %s1125_s10 }
  0xae   : > { %vm1790_vm8 = vmand %vm444_vm5, %vm2433_vm2  ;;  %v1813_v37 = vsub.f32 %v500_v21, %v524_v23  ;;  %v1815_v38 = vsub.f32 %v501_v27, %v520_v22  ;;  %v1817_v39 = vsub.f32 %v502_v28, %v524_v23  ;;  %v1819_v40 = vsub.f32 %v503_v31, %v520_v22  ;;  %s973_s15 = sshll.u32 %s322_s6, 4  ;;  %s2355_s21 = scalar_lea.hbm %s2415_s3, %s1136_s11  ;;  %s2357_s15 = int_to_ptr.vmem [resolvable:$true] %s973_s15 }
  0xaf   : > { %v474_v30 = vsel %vm1790_vm8, 1.0, %v2451_v8  ;;  %v1821_v41 = vsub.f32 %v504_v32, %v524_v23  ;;  %vm2423_vm11 = vcmp.gt.f32.partialorder %v1803_v33, 0.05  ;;  %vm2424_vm12 = vcmp.gt.f32.partialorder %v1805_v34, 0.05  ;;  %vm1827_vm13 = vmand %vm443_vm10, %vm2442_vm7  ;;  %s960_s18 = scalar_lea.sflag [#allocation13], %s320_s9 }
  0xb0   : > { %v399_v43 = vsel %vm2433_vm2, %v392_v36, 0.0  ;;  %v449_v44 = vsel %vm1790_vm8, %v392_v36, 0.0  ;;  %vm2425_vm14 = vcmp.gt.f32.partialorder %v1807_v35, 0.05  ;;  %vm2427_vm15 = vcmp.gt.f32.partialorder %v1813_v37, 0.05  ;;  %vm1841_vm3 = vmand %vm2423_vm11, %vm2442_vm7 }
  0xb1   : > { %v2477_v45 = vsel %vm1841_vm3, 4294967295, %v2476_v45  ;;  %v408_v46 = vsel %vm400_vm1, %v399_v43, 0.0  ;;  %vm2428_vm5 = vcmp.gt.f32.partialorder %v1815_v38, 0.05  ;;  %vm2429_vm6 = vcmp.gt.f32.partialorder %v1817_v39, 0.05  ;;  %vm1852_vm8 = vmand %vm2424_vm12, %vm2433_vm2 }
  0xb2   : > { %v2478_v47 = vmov 0  ;;  %v627_v48 = vsel %vm1841_vm3, 1.0, %v2451_v8  ;;  %v409_v49 = vrot.slane %v408_v46, 4  ;;  %vm2431_vm10 = vcmp.gt.f32.partialorder %v1819_v40, 0.05  ;;  %vm1865_vm11 = vmand %vm2425_vm14, %vm2442_vm7  ;;  %p2602_p6 = scmp.ne.s32.totalorder %s2464_s7, 0 }
  0xb3   : > { %v2479_v47 = vsel %vm1852_vm8, 4294967295, %v2478_v47  ;;  %vm2430_vm4 = vcmp.gt.f32.partialorder %v1821_v41, 0.05  ;;  %v2480_v50 = vmov 0  ;;  %v628_v51 = vsel %vm1852_vm8, 1.0, %v2451_v8  ;;  %vm1876_vm12 = vmand %vm2427_vm15, %vm2433_vm2 }
  0xb4   : > { %v2481_v50 = vsel %vm1865_vm11, 4294967295, %v2480_v50  ;;  %v2482_v52 = vmov 0  ;;  %v629_v53 = vsel %vm1865_vm11, 1.0, %v2451_v8  ;;  %v389_v54 = vsub.f32 %v1761_v13, %v385_v29  ;;  %vm1893_vm15 = vmand %vm2428_vm5, %vm2442_vm7 }
  0xb5   : > { %v2483_v52 = vsel %vm1876_vm12, 4294967295, %v2482_v52  ;;  %v473_v55 = vsel %vm1827_vm13, 1.0, %v2451_v8  ;;  %v410_v56 = vadd.f32 %v409_v49, %v408_v46  ;;  %v2484_v57 = vmov 0  ;;  %vm1904_vm9 = vmand %vm2429_vm6, %vm2433_vm2 }
  0xb6   : > { %v2485_v57 = vsel %vm1893_vm15, 4294967295, %v2484_v57  ;;  %v630_v58 = vsel %vm1876_vm12, 1.0, %v2451_v8  ;;  %v635_v59 = vadd.f32 %v629_v53, %v627_v48  ;;  %v477_v60 = vcombine.low %v473_v55, %v474_v30  ;;  %vm1916_vm14 = vmand %vm2431_vm10, %vm2442_vm7 }
  0xb7   : > { %v2486_v61 = vmov 0  ;;  %v631_v62 = vsel %vm1893_vm15, 1.0, %v2451_v8  ;;  %v636_v63 = vadd.f32 %v630_v58, %v628_v51  ;;  %v391_v0 = vand.u32 2147483647, %v389_v54  ;;  %vm1929_vm6 = vmand %vm2430_vm4, %vm2433_vm2  ;;  %v472_v58 = vld [vmem:[#allocation4] sm:$0x3] }
  0xb8   : > { %v2487_v61 = vsel %vm1904_vm9, 4294967295, %v2486_v61  ;;  %v411_v1 = vrot.slane %v410_v56, 2  ;;  %v2488_v2 = vmov 0  ;;  %v632_v5 = vsel %vm1904_vm9, 1.0, %v2451_v8 }
  0xb9   : > { %v2489_v2 = vsel %vm1916_vm14, 4294967295, %v2488_v2  ;;  %v637_v6 = vadd.f32 %v635_v59, %v631_v62  ;;  %v484_v7 = vrot.slane %v477_v60, %v1765_v15  ;;  %v2491_v9 = vmov 0  ;;  %v505_v59 = vld [vmem:[%s290_s28] sm:$0xff] }
  0xba   : > { %2490 = vst [vmem:[#allocation26_spill] sm:$0xff] %v2489_v2  ;;  %v2492_v9 = vsel %vm1929_vm6, 4294967295, %v2491_v9  ;;  %v633_v16 = vsel %vm1916_vm14, 1.0, %v2451_v8  ;;  %v638_v18 = vadd.f32 %v636_v63, %v632_v5  ;;  %v398_v19 = vsel %vm2442_vm7, %v391_v0, 0.0 }
  0xbb   : > { %2493 = vst [vmem:[#allocation27_spill] sm:$0xff] %v2492_v9  ;;  %v448_v20 = vsel %vm1827_vm13, %v391_v0, 0.0  ;;  %v412_v21 = vadd.f32 %v411_v1, %v410_v56  ;;  %v634_v22 = vsel %vm1929_vm6, 1.0, %v2451_v8  ;;  %v639_v23 = vadd.f32 %v637_v6, %v633_v16 }
  0xbc   : > { %v401_v25 = vsel %vm400_vm1, %v398_v19, 0.0  ;;  %vm2494_vm4 = vcmp.lt.f32.partialorder %v1803_v33, -0.05  ;;  %v2495_v26 = vmov 0  ;;  %v640_v27 = vadd.f32 %v638_v18, %v634_v22  ;;  %v506_v19 = vld [vmem:[%s290_s28 + $0x8] sm:$0xff] }
  0xbd   : > { %vm1948_vm10 = vmand %vm2494_vm4, %vm2442_vm7  ;;  %v402_v28 = vrot.slane %v401_v25, 4  ;;  %v452_v29 = vcombine.low %v448_v20, %v449_v44  ;;  %v485_v30 = vcombine.high %v484_v7, %v484_v7  ;;  %v413_v31 = vrot.slane %v412_v21, 1 }
  0xbe   : > { %v2496_v26 = vsel %vm1948_vm10, 4294967295, %v2495_v26  ;;  %vm2437_vm13 = vcmp.lt.f32.partialorder %v1807_v35, -0.05  ;;  %vm2497_vm1 = vcmp.lt.f32.partialorder %v1805_v34, -0.05  ;;  %v2498_v32 = vmov 0 }
  0xbf   : > { %vm1958_vm6 = vmand %vm2497_vm1, %vm2433_vm2  ;;  %v607_v36 = vsel %vm1948_vm10, 1.0, %v2451_v8  ;;  %v886_v42 = vadd.f32 %v640_v27, %v639_v23  ;;  %v403_v43 = vadd.f32 %v402_v28, %v401_v25  ;;  %v459_v44 = vrot.slane %v452_v29, %v1765_v15  ;;  %v447_v25 = vld [vmem:[#allocation3] sm:$0x3]  ;;  %v507_v28 = vld [vmem:[%s290_s28 + $0x10] sm:$0xff] }
  0xc0   : > { %v2499_v32 = vsel %vm1958_vm6, 4294967295, %v2498_v32  ;;  %v492_v46 = vrot.slane %v485_v30, %v1765_v15  ;;  %vm1971_vm4 = vmand %vm2437_vm13, %vm2442_vm7  ;;  %v2500_v48 = vmov 0  ;;  %v1975_v49 = vadd.f32 %v413_v31, %v412_v21 }
  0xc1   : > { %v2501_v48 = vsel %vm1971_vm4, 4294967295, %v2500_v48  ;;  %vm2439_vm1 = vcmp.lt.f32.partialorder %v1815_v38, -0.05  ;;  %vm2502_vm14 = vcmp.lt.s32.totalorder %v1759_v12, 300  ;;  %vm2503_vm9 = vcmp.lt.f32.partialorder %v1813_v37, -0.05  ;;  %887 = vadd.xlane.f32.xlu0 %v886_v42 }
  0xc2   : > { %vm1984_vm15 = vmand %vm2503_vm9, %vm2502_vm14  ;;  %v2504_v51 = vmov 0  ;;  %v404_v53 = vrot.slane %v403_v43, 2  ;;  %v460_v54 = vcombine.high %v459_v44, %v459_v44  ;;  %v493_v55 = vcombine.high %v492_v46, %v492_v46  ;;  %v508_v44 = vld [vmem:[%s290_s28 + $0x18] sm:$0xff]  ;;  %s1338_s28 = scalar_lea.vmem %s2357_s15, 128 }
  0xc3   : > { %v2505_v51 = vsel %vm1984_vm15, 4294967295, %v2504_v51  ;;  %vm1993_vm5 = vmand %vm2439_vm1, %vm2442_vm7  ;;  %v2506_v56 = vmov 0  ;;  %vm2508_vm2 = vcmp.lt.f32.partialorder %v1817_v39, -0.05  ;;  %v2509_v60 = vmov 0  ;;  %p1339_p8 = scmp.ne.s32.totalorder %s2357_s15, %s1338_s28 }
  0xc4   : > { %v2507_v56 = vsel %vm1993_vm5, 4294967295, %v2506_v56  ;;  %vm2004_vm12 = vmand %vm2508_vm2, %vm2502_vm14  ;;  %v608_v62 = vsel %vm1958_vm6, 1.0, %v2451_v8  ;;  %v609_v63 = vsel %vm1971_vm4, 1.0, %v2451_v8  ;;  %v610_v0 = vsel %vm1984_vm15, 1.0, %v2451_v8 }
  0xc5   : > { %v2510_v60 = vsel %vm2004_vm12, 4294967295, %v2509_v60  ;;  %v611_v1 = vsel %vm1993_vm5, 1.0, %v2451_v8  ;;  %vm2511_vm2 = vcmp.lt.f32.partialorder %v1761_v13, 8.0  ;;  %vm2512_vm14 = vcmp.gt.f32.partialorder %v1761_v13, 0.0  ;;  %p1340_p1 = pnand %p1339_p8, %p2602_p6 }
  0xc6   : > { %vm2024_vm9 = vmand %vm2512_vm14, %vm2511_vm2  ;;  %v405_v6 = vadd.f32 %v404_v53, %v403_v43  ;;  %v467_v7 = vrot.slane %v460_v54, %v1765_v15  ;;  %vm2515_vm1 = vcmp.lt.f32.partialorder %v1819_v40, -0.05  ;;  %v2516_v16 = vmov 0 }
  0xc7   : > { %vm2033_vm13 = vmand %vm2515_vm1, %vm2442_vm7  ;;  %v612_v18 = vsel %vm2004_vm12, 1.0, %v2451_v8  ;;  %v615_v13 = vadd.f32 %v609_v63, %v607_v36  ;;  %vm2518_vm2 = vcmp.lt.s32.totalorder %v1759_v12, 300  ;;  %vm2519_vm14 = vcmp.lt.f32.partialorder %v1821_v41, -0.05  ;;  %p1341_p2 = pneg %p1340_p1 }
  0xc8   : > { %v2517_v16 = vsel %vm2033_vm13, 4294967295, %v2516_v16  ;;  %vm2044_vm11 = vmand %vm2519_vm14, %vm2518_vm2  ;;  %v2520_v20 = vmov 0  ;;  %vm2522_vm8 = vcmp.gt.f32.partialorder %v1803_v33, 0.05  ;;  %vm2523_vm1 = vcmp.lt.f32.partialorder %v1803_v33, -0.05 }
  0xc9   : > { %v2521_v20 = vsel %vm2044_vm11, 4294967295, %v2520_v20  ;;  %vm2052_vm7 = vmor %vm2523_vm1, %vm2522_vm8  ;;  %v613_v22 = vsel %vm2033_vm13, 1.0, %v2451_v8  ;;  %v616_v23 = vadd.f32 %v610_v0, %v608_v62  ;;  %v495_v27 = vadd.f32 %v493_v55, %v472_v58 }
  0xca   : > { %v2059_v29 = vunpack.c.l.bf16 %v505_v59  ;;  %v406_v30 = vrot.slane %v405_v6, 1  ;;  %v468_v31 = vcombine.high %v467_v7, %v467_v7  ;;  %vm2526_vm2 = vcmp.gt.f32.partialorder %v1805_v34, 0.05 }
  0xcb   : > { %vm2527_vm14 = vcmp.lt.f32.partialorder %v1805_v34, -0.05  ;;  %v614_v42 = vsel %vm2044_vm11, 1.0, %v2451_v8  ;;  %v617_v43 = vadd.f32 %v615_v13, %v611_v1  ;;  %vm2530_vm1 = vcmp.gt.f32.partialorder %v1807_v35, 0.05 }
  0xcc   : > { %vm2065_vm8 = vmor %vm2527_vm14, %vm2526_vm2  ;;  %vm2531_vm3 = vcmp.lt.f32.partialorder %v1807_v35, -0.05  ;;  %v618_v53 = vadd.f32 %v616_v23, %v612_v18  ;;  %496 = vst.msk [vmem:[#allocation4] sm:$0x3] %vm1738_vm0, %v495_v27  ;;  %v2082_v54 = vunpack.c.h.bf16 %v505_v59  ;;  %v2084_v55 = vunpack.c.l.bf16 %v506_v19 }
  0xcd   : > { %vm2076_vm13 = vmor %vm2531_vm3, %vm2530_vm1  ;;  %v2086_v58 = vunpack.c.h.bf16 %v506_v19  ;;  %v407_v62 = vadd.f32 %v406_v30, %v405_v6  ;;  %vm2534_vm2 = vcmp.gt.f32.partialorder %v1813_v37, 0.05  ;;  %vm2535_vm14 = vcmp.lt.f32.partialorder %v1813_v37, -0.05 }
  0xce   : > { %vm2092_vm11 = vmor %vm2535_vm14, %vm2534_vm2  ;;  %v619_v0 = vadd.f32 %v617_v43, %v613_v22  ;;  %v470_v1 = vadd.f32 %v468_v31, %v447_v25  ;;  %v2096_v7 = vunpack.c.l.bf16 %v507_v28  ;;  %vm2538_vm1 = vcmp.gt.f32.partialorder %v1815_v38, 0.05 }
  0xcf   : > { %vm2539_vm12 = vcmp.lt.f32.partialorder %v1815_v38, -0.05  ;;  %v620_v6 = vadd.f32 %v618_v53, %v614_v42  ;;  %v2106_v18 = vunpack.c.h.bf16 %v507_v28  ;;  %v2108_v13 = vunpack.c.l.bf16 %v508_v44 }
  0xd0   : > { %vm2102_vm5 = vmor %vm2539_vm12, %vm2538_vm1  ;;  %v2110_v19 = vunpack.c.h.bf16 %v508_v44  ;;  %v417_v22 = vcombine.low %v407_v62, %v1975_v49  ;;  %vm2542_vm2 = vcmp.gt.f32.partialorder %v1817_v39, 0.05  ;;  %vm2543_vm14 = vcmp.lt.f32.partialorder %v1817_v39, -0.05  ;;  %471 = vst.msk [vmem:[#allocation3] sm:$0x3] %vm1738_vm0, %v470_v1 }
  0xd1   : > { %vm2117_vm3 = vmor %vm2543_vm14, %vm2542_vm2  ;;  %v739_v25 = vmul.f32 0.05, %v2059_v29  ;;  %v740_v27 = vmul.f32 0.05, %v2082_v54  ;;  %v741_v28 = vmul.f32 0.05, %v2084_v55  ;;  %v871_v30 = vadd.f32 %v620_v6, %v619_v0 }
  0xd2   : > { %vm2546_vm12 = vcmp.gt.f32.partialorder %v1819_v40, 0.05  ;;  %vm2547_vm1 = vcmp.lt.f32.partialorder %v1819_v40, -0.05  ;;  %v742_v31 = vmul.f32 0.05, %v2086_v58  ;;  %v424_v44 = vrot.slane %v417_v22, %v1765_v15 }
  0xd3   : > { %vm2130_vm15 = vmor %vm2547_vm1, %vm2546_vm12  ;;  %v743_v42 = vmul.f32 0.05, %v2096_v7  ;;  %v744_v43 = vmul.f32 0.05, %v2106_v18  ;;  %vm2550_vm2 = vcmp.gt.f32.partialorder %v1821_v41, 0.05  ;;  %v747_v1 = vadd.f32 %v739_v25, %v1803_v33  ;;  %872 = vadd.xlane.f32.xlu1 %v871_v30 }
  0xd4   : > { %vm2551_vm14 = vcmp.lt.f32.partialorder %v1821_v41, -0.05  ;;  %v745_v62 = vmul.f32 0.05, %v2108_v13  ;;  %v746_v0 = vmul.f32 0.05, %v2110_v19  ;;  %v748_v22 = vadd.f32 %v740_v27, %v1805_v34 }
  0xd5   : > { %vm2142_vm4 = vmor %vm2551_vm14, %vm2550_vm2  ;;  %vm2554_vm12 = vcmp.lt.f32.partialorder %v1763_v14, 8.0  ;;  %vm2555_vm1 = vcmp.gt.f32.partialorder %v1763_v14, 0.0  ;;  %v393_v6 = vld [vmem:[#allocation2] sm:$0x3]  ;;  %v749_v8 = vadd.f32 %v741_v28, %v1807_v35  ;;  %v750_v4 = vadd.f32 %v742_v31, %v1813_v37  ;;  %v842_v2 = vld [vmem:[#allocation4] sm:$0x3] }
  0xd6   : > { %vm552_vm6 = vmand %vm2555_vm1, %vm2554_vm12  ;;  %v751_v9 = vadd.f32 %v743_v42, %v1815_v38  ;;  %vm2556_vm2 = vcmp.lt.s32.totalorder %v1757_v11, 300  ;;  %v431_v33 = vrot.slane %v424_v44, %v1765_v15  ;;  %v752_v14 = vadd.f32 %v744_v43, %v1817_v39 }
  0xd7   : > { %vm553_vm14 = vmand %vm2024_vm9, %vm2556_vm2  ;;  %v753_v25 = vadd.f32 %v745_v62, %v1819_v40  ;;  %v754_v34 = vadd.f32 %v746_v0, %v1821_v41  ;;  %v847_v35 = vrot.slane %v842_v2, %v1768_v17  ;;  %v851_v37 = vrot.slane %v842_v2, %v1784_v24  ;;  %v815_v2 = vld [vmem:[#allocation3] sm:$0x3] }
  0xd8   : > { %vm2557_vm12 = vcmp.lt.s32.totalorder %v1759_v12, 300  ;;  %v1459_v38 = vmov 0   ;;  %v755_v27 = vmul.f32 %v747_v1, %v747_v1  ;;  %vm1460_vm10 = vmmov 1  }
  0xd9   : > { %vm554_vm1 = vmand %vm552_vm6, %vm2557_vm12  ;;  %v587_v11 = vsel %vm553_vm14, 1, %v1459_v38  ;;  %v433_v41 = vadd.f32 %v431_v33, %v393_v6  ;;  %v756_v5 = vmul.f32 %v748_v22, %v748_v22  ;;  %vm2560_vm2 = vcmask 1040384  }
  0xda   : > { %vm2172_vm9 = vmxor %vm2052_vm7, %vm1460_vm10  ;;  %v588_v39 = vsel %vm554_vm1, 1, %v1459_v38  ;;  %v592_v40 = vrot.slane %v587_v11, %v1754_v10  ;;  %v854_v12 = vsel %vm2560_vm2, %v847_v35, 0.0  ;;  %v757_v31 = vmul.f32 %v749_v8, %v749_v8 }
  0xdb   : > { %vm2561_vm6 = vmmov %vm2560_vm2  ;;  %v596_v21 = vrot.slane %v588_v39, %v1754_v10  ;;  %v820_v42 = vrot.slane %v815_v2, %v1768_v17  ;;  %v824_v43 = vrot.slane %v815_v2, %v1784_v24  ;;  %438 = vst.msk [vmem:[#allocation2] sm:$0x3] %vm1738_vm0, %v433_v41  ;;  %v758_v46 = vmul.f32 %v750_v4, %v750_v4 }
  0xdc   : > { %v855_v28 = vsel %vm2561_vm6, %v851_v37, 0.0  ;;  %vm2182_vm14 = vmxor %vm2065_vm8, %vm1460_vm10  ;;  %vm2196_vm12 = vcmp.eq.s32.totalorder %v592_v40, 1  ;;  %v759_v0 = vmul.f32 %v751_v9, %v751_v9  ;;  %v760_v1 = vmul.f32 %v752_v14, %v752_v14 }
  0xdd   : > { %v856_v44 = vadd.f32 %v855_v28, %v854_v12  ;;  %vm2192_vm7 = vmxor %vm2076_vm13, %vm1460_vm10  ;;  %vm2209_vm1 = vcmp.eq.s32.totalorder %v596_v21, 1  ;;  %v828_v22 = vsel %vm2560_vm2, %v824_v43, 0.0  ;;  %v761_v63 = vmul.f32 %v753_v25, %v753_v25 }
  0xde   : > { %vm2205_vm8 = vmxor %vm2092_vm11, %vm1460_vm10  ;;  %v762_v33 = vmul.f32 %v754_v34, %v754_v34  ;;  %v1127_v9 = vadd.f32 -1.0, %v2059_v29  ;;  %v1128_v14 = vadd.f32 -1.0, %v2082_v54  ;;  %v1129_v59 = vadd.f32 -1.0, %v2084_v55 }
  0xdf   : > { %vm2572_vm13 = vmmov %vm2560_vm2  ;;  %857 = vadd.xlane.f32.xlu1 %v856_v44  ;;  %v1130_v34 = vadd.f32 -1.0, %v2086_v58  ;;  %v1131_v23 = vadd.f32 -1.0, %v2096_v7  ;;  %v1132_v37 = vadd.f32 -1.0, %v2106_v18  ;;  %v1133_v38 = vadd.f32 -1.0, %v2108_v13 }
  0xe0   : > { %v827_v6 = vsel %vm2572_vm13, %v820_v42, 0.0  ;;  %vm2218_vm0 = vmxor %vm2102_vm5, %vm1460_vm10  ;;  %v1134_v49 = vadd.f32 -1.0, %v2110_v19  ;;  %v675_v39 = vmul.f32 %v1127_v9, %v1127_v9  ;;  %v676_v40 = vmul.f32 %v1128_v14, %v1128_v14 }
  0xe1   : > { %v829_v35 = vadd.f32 %v828_v22, %v827_v6  ;;  %vm2225_vm11 = vmxor %vm2117_vm3, %vm1460_vm10  ;;  %v677_v41 = vmul.f32 %v1129_v59, %v1129_v59  ;;  %v678_v2 = vmul.f32 %v1130_v34, %v1130_v34  ;;  %v679_v12 = vmul.f32 %v1131_v23, %v1131_v23 }
  0xe2   : > { %vm2235_vm5 = vmxor %vm2130_vm15, %vm1460_vm10  ;;  %v680_v28 = vmul.f32 %v1132_v37, %v1132_v37  ;;  %v2255_v21 = vmul.f32 %v1133_v38, %v1133_v38  ;;  %v2581_v53 = vmov 0.0   ;;  %v787_v43 = vld [vmem:[#allocation2] sm:$0x3]  ;;  %v2262_v6 = vmul.f32 %v1134_v49, %v1134_v49 }
  0xe3   : > { %830 = vadd.xlane.f32.xlu0 %v829_v35  ;;  %vm2246_vm3 = vmxor %vm2142_vm4, %vm1460_vm10  ;;  %vm2582_vm4 = vnez %v2496_v26  ;;  %v792_v35 = vrot.slane %v787_v43, %v1768_v17  ;;  %v796_v30 = vrot.slane %v787_v43, %v1784_v24 }
  0xe4   : > { %vm599_vm15 = vmand %vm2172_vm9, %vm2196_vm12  ;;  %v683_v15 = vsel %vm2582_vm4, %v675_v39, 0.0  ;;  %vm2591_vm4 = vnez %v2477_v45 }
  0xe5   : > { %vm600_vm10 = vmand %vm2182_vm14, %vm2209_vm1  ;;  %v647_v42 = vsel %vm599_vm15, 1.0, %v2581_v53  ;;  %v763_v44 = vsel %vm599_vm15, %v755_v27, 0.0  ;;  %vm2583_vm14 = vnez %v2499_v32 }
  0xe6   : > { %vm601_vm9 = vmand %vm2192_vm7, %vm2196_vm12  ;;  %v648_v22 = vsel %vm600_vm10, 1.0, %v2581_v53  ;;  %v764_v9 = vsel %vm600_vm10, %v756_v5, 0.0  ;;  %v684_v14 = vsel %vm2583_vm14, %v676_v40, 0.0  ;;  %vm2584_vm7 = vnez %v2501_v48 }
  0xe7   : > { %vm602_vm6 = vmand %vm2205_vm8, %vm2209_vm1  ;;  %v649_v26 = vsel %vm601_vm9, 1.0, %v2581_v53  ;;  %v765_v27 = vsel %vm601_vm9, %v757_v31, 0.0  ;;  %v685_v62 = vsel %vm2584_vm7, %v677_v41, 0.0  ;;  %v800_v5 = vsel %vm2560_vm2, %v792_v35, 0.0 }
  0xe8   : > { %vm603_vm13 = vmand %vm2218_vm0, %vm2196_vm12  ;;  %v650_v17 = vsel %vm602_vm6, 1.0, %v2581_v53  ;;  %v655_v24 = vadd.f32 %v649_v26, %v647_v42  ;;  %v766_v59 = vsel %vm602_vm6, %v758_v46, 0.0  ;;  %v771_v49 = vadd.f32 %v765_v27, %v763_v44 }
  0xe9   : > { %vm2585_vm8 = vmmov %vm2560_vm2  ;;  %v651_v32 = vsel %vm603_vm13, 1.0, %v2581_v53  ;;  %v656_v48 = vadd.f32 %v650_v17, %v648_v22  ;;  %v767_v23 = vsel %vm603_vm13, %v759_v0, 0.0  ;;  %v772_v40 = vadd.f32 %v766_v59, %v764_v9 }
  0xea   : > { %v801_v8 = vsel %vm2585_vm8, %v796_v30, 0.0  ;;  %vm604_vm15 = vmand %vm2225_vm11, %vm2209_vm1  ;;  %v657_v34 = vadd.f32 %v655_v24, %v651_v32  ;;  %v773_v42 = vadd.f32 %v771_v49, %v767_v23  ;;  %vm2590_vm10 = vnez %v2521_v20  ;;  %v2597_v32 = vld [vmem:[#allocation26_spill] sm:$0xff] }
  0xeb   : > { %v802_v31 = vadd.f32 %v801_v8, %v800_v5  ;;  %vm605_vm0 = vmand %vm2235_vm5, %vm2196_vm12  ;;  %v652_v3 = vsel %vm604_vm15, 1.0, %v2581_v53  ;;  %v768_v37 = vsel %vm604_vm15, %v760_v1, 0.0  ;;  %vm2586_vm12 = vnez %v2505_v51 }
  0xec   : > { %vm606_vm11 = vmand %vm2246_vm3, %vm2209_vm1  ;;  %v653_v4 = vsel %vm605_vm0, 1.0, %v2581_v53  ;;  %v658_v38 = vadd.f32 %v656_v48, %v652_v3  ;;  %v769_v46 = vsel %vm605_vm0, %v761_v63, 0.0  ;;  %v686_v0 = vsel %vm2586_vm12, %v678_v2, 0.0 }
  0xed   : > { %803 = vadd.xlane.f32.xlu0 %v802_v31  ;;  %v654_v36 = vsel %vm606_vm11, 1.0, %v2581_v53  ;;  %v659_v25 = vadd.f32 %v657_v34, %v653_v4  ;;  %v770_v39 = vsel %vm606_vm11, %v762_v33, 0.0  ;;  %vm2587_vm5 = vnez %v2507_v56 }
  0xee   : > { %v660_v41 = vadd.f32 %v658_v38, %v654_v36  ;;  %v687_v10 = vsel %vm2587_vm5, %v679_v12, 0.0  ;;  %v774_v1 = vadd.f32 %v772_v40, %v768_v37  ;;  %vm2588_vm1 = vnez %v2510_v60 }
  0xef   : > { %v688_v11 = vsel %vm2588_vm1, %v680_v28, 0.0  ;;  %vm2589_vm3 = vnez %v2517_v16  ;;  %v690_v33 = vsel %vm2590_vm10, %v2262_v6, 0.0  ;;  %v775_v43 = vadd.f32 %v773_v42, %v769_v46 }
  0xf0   : > { %v689_v63 = vsel %vm2589_vm3, %v2255_v21, 0.0  ;;  %v901_v53 = vadd.f32 %v660_v41, %v659_v25  ;;  %v691_v44 = vadd.f32 %v685_v62, %v683_v15  ;;  %v692_v51 = vadd.f32 %v686_v0, %v684_v14 }
  0xf1   : > { %v776_v2 = vadd.f32 %v774_v1, %v770_v39  ;;  %v703_v56 = vadd.f32 1.0, %v2059_v29  ;;  %v704_v12 = vadd.f32 1.0, %v2082_v54  ;;  %v705_v60 = vadd.f32 1.0, %v2084_v55 }
  0xf2   : > { %902 = vadd.xlane.f32.xlu1 %v901_v53  ;;  %v693_v28 = vadd.f32 %v691_v44, %v687_v10  ;;  %v694_v22 = vadd.f32 %v692_v51, %v688_v11  ;;  %v706_v16 = vadd.f32 1.0, %v2086_v58  ;;  %v707_v21 = vadd.f32 1.0, %v2096_v7 }
  0xf3   : > { %v931_v20 = vadd.f32 %v776_v2, %v775_v43  ;;  %v708_v6 = vadd.f32 1.0, %v2106_v18  ;;  %v709_v15 = vadd.f32 1.0, %v2108_v13  ;;  %v710_v35 = vadd.f32 1.0, %v2110_v19 }
  0xf4   : > { %v695_v30 = vadd.f32 %v693_v28, %v689_v63  ;;  %v696_v29 = vadd.f32 %v694_v22, %v690_v33  ;;  %v711_v9 = vmul.f32 %v703_v56, %v703_v56  ;;  %v712_v54 = vmul.f32 %v704_v12, %v704_v12 }
  0xf5   : > { %v713_v26 = vmul.f32 %v705_v60, %v705_v60  ;;  %v714_v55 = vmul.f32 %v706_v16, %v706_v16  ;;  %v715_v27 = vmul.f32 %v707_v21, %v707_v21  ;;  %v716_v14 = vmul.f32 %v708_v6, %v708_v6 }
  0xf6   : > { %932 = vadd.xlane.f32.xlu1 %v931_v20  ;;  %v916_v62 = vadd.f32 %v696_v29, %v695_v30  ;;  %v717_v58 = vmul.f32 %v709_v15, %v709_v15  ;;  %v718_v17 = vmul.f32 %v710_v35, %v710_v35  ;;  %v719_v7 = vsel %vm2591_vm4, %v711_v9, 0.0 }
  0xf7   : > { %vm2592_vm9 = vnez %v2479_v47  ;;  %vm2593_vm6 = vnez %v2481_v50  ;;  %vm2594_vm14 = vnez %v2483_v52  ;;  %vm2595_vm7 = vnez %v2485_v57  ;;  %v2599_v47 = vld [vmem:[#allocation27_spill] sm:$0xff] }
  0xf8   : > { %v720_v18 = vsel %vm2592_vm9, %v712_v54, 0.0  ;;  %v721_v13 = vsel %vm2593_vm6, %v713_v26, 0.0  ;;  %v722_v19 = vsel %vm2594_vm14, %v714_v55, 0.0  ;;  %v723_v24 = vsel %vm2595_vm7, %v715_v27, 0.0  ;;  %917 = vadd.xlane.f32.xlu0 %v916_v62 }
  0xf9   : > { %vm2596_vm13 = vnez %v2487_v61  ;;  %v727_v8 = vadd.f32 %v721_v13, %v719_v7  ;;  %vm2598_vm2 = vnez %v2597_v32  ;;  %v728_v48 = vadd.f32 %v722_v19, %v720_v18 }
  0xfa   : > { %v724_v5 = vsel %vm2596_vm13, %v716_v14, 0.0  ;;  %v725_v45 = vsel %vm2598_vm2, %v717_v58, 0.0  ;;  %vm2600_vm8 = vnez %v2599_v47 }
  0xfb   : > { %v726_v31 = vsel %vm2600_vm8, %v718_v17, 0.0  ;;  %v729_v50 = vadd.f32 %v727_v8, %v723_v24  ;;  %v730_v59 = vadd.f32 %v728_v48, %v724_v5 }
  0xfd   : > { %v731_v3 = vadd.f32 %v729_v50, %v725_v45  ;;  %v732_v52 = vadd.f32 %v730_v59, %v726_v31 }
  0xff   : > { %v946_v34 = vadd.f32 %v732_v52, %v731_v3 }
 0x101   : > { %947 = vadd.xlane.f32.xlu0 %v946_v34  ;;  %v2601_v34 = vld [vmem:[#allocation25_spill] sm:$0xff] }
 0x102   : > { %vm786_vm15 = vcmp.eq.s32.totalorder %v2601_v34, 0  ;;  %vm814_vm0 = vcmp.eq.s32.totalorder %v2601_v34, 1  ;;  %vm841_vm11 = vcmp.eq.s32.totalorder %v2601_v34, 2  ;;  %vm868_vm12 = vcmp.eq.s32.totalorder %v2601_v34, 3 }
 0x103   : > { %vm883_vm5 = vcmp.eq.s32.totalorder %v2601_v34, 4  ;;  %vm898_vm1 = vcmp.eq.s32.totalorder %v2601_v34, 5  ;;  %vm913_vm3 = vcmp.eq.s32.totalorder %v2601_v34, 6  ;;  %vm928_vm10 = vcmp.eq.s32.totalorder %v2601_v34, 7 }
 0x104   : > { %vm943_vm4 = vcmp.eq.s32.totalorder %v2601_v34, 8 }
 0x14e   : > { %v888_v23 = vpop.xlane.xlu0 %887 }
 0x14f   : > { %v889_v49 = vrot.slane %v888_v23, 4 }
 0x151   : > { %v890_v40 = vadd.f32 %v889_v49, %v888_v23 }
 0x153   : > { %v891_v11 = vrot.slane %v890_v40, 2 }
 0x155   : > { %v892_v12 = vadd.f32 %v891_v11, %v890_v40 }
 0x157   : > { %v893_v30 = vrot.slane %v892_v12, 1 }
 0x159   : > { %v894_v17 = vadd.f32 %v893_v30, %v892_v12 }
 0x160   : > { %v873_v57 = vpop.xlane.xlu1 %872 }
 0x161   : > { %v874_v46 = vrot.slane %v873_v57, 4 }
 0x163   : > { %v875_v39 = vadd.f32 %v874_v46, %v873_v57 }
 0x165   : > { %v876_v1 = vrot.slane %v875_v39, 2 }
 0x167   : > { %v877_v51 = vadd.f32 %v876_v1, %v875_v39 }
 0x169   : > { %v878_v20 = vrot.slane %v877_v51, 1 }
 0x16b   : > { %v879_v14 = vadd.f32 %v878_v20, %v877_v51 }
 0x16c   : > { %v858_v37 = vpop.xlane.xlu1 %857 }
 0x16d   : > { %v859_v38 = vrot.slane %v858_v37, 4 }
 0x16f   : > { %v860_v25 = vadd.f32 %v859_v38, %v858_v37 }
 0x170   : > { %v831_v4 = vpop.xlane.xlu0 %830 }
 0x171   : > { %v832_v61 = vrot.slane %v831_v4, 4  ;;  %v861_v0 = vrot.slane %v860_v25, 2 }
 0x173   : > { %v833_v36 = vadd.f32 %v832_v61, %v831_v4  ;;  %v862_v43 = vadd.f32 %v861_v0, %v860_v25 }
 0x175   : > { %v834_v41 = vrot.slane %v833_v36, 2  ;;  %v863_v16 = vrot.slane %v862_v43, 1 }
 0x177   : > { %v835_v33 = vadd.f32 %v834_v41, %v833_v36  ;;  %v864_v55 = vadd.f32 %v863_v16, %v862_v43 }
 0x179   : > { %v836_v60 = vrot.slane %v835_v33, 1 }
 0x17a   : > { %v804_v42 = vpop.xlane.xlu0 %803 }
 0x17b   : > { %v805_v10 = vrot.slane %v804_v42, 4  ;;  %v837_v9 = vadd.f32 %v836_v60, %v835_v33 }
 0x17d   : > { %v806_v63 = vadd.f32 %v805_v10, %v804_v42 }
 0x17f   : > { %v807_v53 = vrot.slane %v806_v63, 2  ;;  %v903_v44 = vpop.xlane.xlu1 %902 }
 0x180   : > { %v904_v2 = vrot.slane %v903_v44, 4 }
 0x181   : > { %v808_v56 = vadd.f32 %v807_v53, %v806_v63 }
 0x182   : > { %v905_v28 = vadd.f32 %v904_v2, %v903_v44 }
 0x183   : > { %v809_v22 = vrot.slane %v808_v56, 1  ;;  %v933_v21 = vpop.xlane.xlu1 %932 }
 0x184   : > { %v906_v6 = vrot.slane %v905_v28, 2  ;;  %v934_v15 = vrot.slane %v933_v21, 4 }
 0x185   : > { %v810_v35 = vadd.f32 %v809_v22, %v808_v56  ;;  %v918_v29 = vpop.xlane.xlu0 %917 }
 0x186   : > { %v935_v54 = vadd.f32 %v934_v15, %v933_v21  ;;  %v919_v26 = vrot.slane %v918_v29, 4  ;;  %v907_v27 = vadd.f32 %v906_v6, %v905_v28 }
 0x187   : > { %1146 = vpush %v810_v35 }
 0x188   : > { %1148 = vpush %v837_v9  ;;  %v936_v62 = vrot.slane %v935_v54, 2  ;;  %v920_v58 = vadd.f32 %v919_v26, %v918_v29  ;;  %v908_v7 = vrot.slane %v907_v27, 1 }
 0x189   : > { %1150 = vpush %v864_v55 }
 0x18a   : > { %1152 = vpush %v879_v14  ;;  %v937_v18 = vadd.f32 %v936_v62, %v935_v54  ;;  %v921_v13 = vrot.slane %v920_v58, 2  ;;  %v909_v19 = vadd.f32 %v908_v7, %v907_v27 }
 0x18b   : > { %1154 = vpush %v894_v17 }
 0x18c   : > { %1156 = vpush %v909_v19  ;;  %v922_v24 = vadd.f32 %v921_v13, %v920_v58  ;;  %v938_v5 = vrot.slane %v937_v18, 1 }
 0x18e   : > { %v948_v8 = vpop.xlane.xlu0 %947  ;;  %v923_v32 = vrot.slane %v922_v24, 1  ;;  %v939_v31 = vadd.f32 %v938_v5, %v937_v18 }
 0x18f   : > { %v949_v45 = vrot.slane %v948_v8, 4 }
 0x190   : > { %v924_v48 = vadd.f32 %v923_v32, %v922_v24 }
 0x191   : > { %v950_v47 = vadd.f32 %v949_v45, %v948_v8 }
 0x192   : > { %1158 = vpush %v924_v48 }
 0x193   : > { %v951_v50 = vrot.slane %v950_v47, 2  ;;  %1160 = vpush %v939_v31 }
 0x195   : > { %v952_v59 = vadd.f32 %v951_v50, %v950_v47 }
 0x197   : > { %v953_v3 = vrot.slane %v952_v59, 1 }
 0x199   : > { %v954_v52 = vadd.f32 %v953_v3, %v952_v59 }
 0x19b   : > { %1162 = vpush %v954_v52 }
 0x1b8   : > { %s1147_s22 = spop %1146 }
 0x1b9   : > { %v812_v57 = vstv %s1147_s22  ;;  %s1149_s26 = spop %1148  ;;  %s1461_s22 = smov [#allocation17]  }
 0x1ba   : > { %v813_v23 = vsel %vm786_vm15, %v812_v57, 0.0  ;;  %v839_v37 = vstv %s1149_s26  ;;  %s1151_s27 = spop %1150  ;;  %s1342_s26 = sshll.u32 %s1461_s22, 4  ;;  %s1343_s26 = int_to_ptr.vmem [resolvable:$false] %s1342_s26 }
 0x1bb   : > { %v840_v4 = vsel %vm814_vm0, %v839_v37, %v813_v23  ;;  %v866_v61 = vstv %s1151_s27  ;;  %s1153_s30 = spop %1152  ;;  %s1344_s27 = scalar_lea.vmem %s1343_s26, 256 }
 0x1bc   : > { %v867_v38 = vsel %vm841_vm11, %v866_v61, %v840_v4  ;;  %v881_v46 = vstv %s1153_s30  ;;  %s1155_s4 = spop %1154  ;;  %p1345_p10 = scmp.lt.s32.totalorder %s2357_s15, %s1343_s26 }
 0x1bd   : > { %v882_v49 = vsel %vm868_vm12, %v881_v46, %v867_v38  ;;  %v896_v36 = vstv %s1155_s4  ;;  %s1157_s23 = spop %1156  ;;  %p1346_p5 = scmp.lt.s32.totalorder %s1344_s27, %s1338_s28 }
 0x1be   : > { %v897_v25 = vsel %vm883_vm5, %v896_v36, %v882_v49  ;;  %v911_v39 = vstv %s1157_s23 }
 0x1bf   : > { %v912_v40 = vsel %vm898_vm1, %v911_v39, %v897_v25  ;;  %p1347_p12 = por %p1346_p5, %p1345_p10 }
 0x1c1   : > { %p1348_p13 = pnand %p1347_p12, %p1341_p2 }
 0x1c3   : > { %s1159_s25 = spop %1158 }
 0x1c4   : > { %v926_v41 = vstv %s1159_s25  ;;  %s1161_s29 = spop %1160 }
 0x1c5   : > { %v927_v42 = vsel %vm913_vm3, %v926_v41, %v912_v40  ;;  %v941_v0 = vstv %s1161_s29 }
 0x1c6   : > { %v942_v10 = vsel %vm928_vm10, %v941_v0, %v927_v42 }
 0x1cc   : > { %s1163_s24 = spop %1162 }
 0x1cd   : > { %v956_v1 = vstv %s1163_s24 }
 0x1ce   : > { %v957_v11 = vsel %vm943_vm4, %v956_v1, %v942_v10 }
 0x1cf   : > { %958 = vst [vmem:[%s322_s6] sm:$0xff] %v957_v11 }
 0x1d0   : > { %1351 = shalt.err (!%p1348_p13)
}
 0x1d1   : > { %s1352_s30 = scalar_lea.hbm %s2355_s21, 128  ;;  %s1356_s9 = scalar_lea.hbm %s2415_s3, 256 }
 0x1d2   : > { %p1353_p0 = scmp.ne.s32.totalorder %s2355_s21, %s1352_s30  ;;  %p1357_p9 = scmp.lt.u32.totalorder %s2355_s21, %s2415_s3 }
 0x1d3   : > { %p1358_p11 = scmp.lt.u32.totalorder %s1356_s9, %s1352_s30  ;;  %p1360_p8 = scmp.lt.u32.totalorder %s1352_s30, %s2355_s21 }
 0x1d4   : > { %p1354_p7 = pnand %p1353_p0, %p2602_p6 }
 0x1d5   : > { %p1359_p3 = por %p1358_p11, %p1357_p9 }
 0x1d6   : > { %p1355_p4 = pneg %p1354_p7 }
 0x1d7   : > { %p1361_p1 = por %p1360_p8, %p1359_p3 }
 0x1d9   : > { %p1362_p2 = pnand %p1361_p1, %p1355_p4 }
 0x1db   : > { %1365 = shalt.err (!%p1362_p2)
}
 0x1dc   : > { %1167 = dma.vmem_to_hbm [thread:$0]  (%p2602_p6), %s2357_s15, 128, %s2355_s21, %s960_s18  }
 0x1dd PF: > { %s985_s29 = sand.u32 1, %s1416_s12   ;;  %p2603_p10 = scmp.ne.s32.totalorder %s2465_s8, 0 }
 0x1de   : > { %p2604_p5 = scmp.ge.s32.totalorder %s1448_s20, 2  ;;  %s986_s11 = scalar_lea.sflag [#allocation13], %s985_s29 }
 0x1e0   : > { %p1170_p12 = pnand %p2604_p5, %p2603_p10 }
 0x1e2   : > { %1411 = dma.done.wait (!%p1170_p12), %s986_s11, 128  }
 0x1e3   : > { %1413 = vsyncadd (!%p1170_p12), %s986_s11, 4294967168  ;;  %s22_s20 = sadd.s32 1, %s1448_s20   ;;  %s2605_s7 = sld [smem:[#allocation23_spill]] }
 0x1e4   : > { %p19_p13 = scmp.ge.s32.totalorder %s22_s20, 4   ;;  %s2606_s6 = sld [smem:[#allocation24_spill]] }
 0x1e5   : > { %s2607_s18 = sld [smem:[#allocation21_spill]]  ;;  %s2608_s19 = sld [smem:[#allocation22_spill]] }
 0x1e6   : > { %s2609_s12 = smov %s1420_s13  ;;  %s2610_s13 = smov %s1424_s14 }
 0x1e7   : > { %s2612_s15 = smov %s1432_s16  ;;  %s2613_s16 = smov %s1436_s17 }
 0x1e8   :  { %21 = sbr.rel (!%p19_p13) target bundleno = 10 (0xa), region = 109 }
 0x1e9   : > { %s2611_s14 = smov %s2605_s7 }
 0x1ea   : > { %s2614_s17 = smov %s2606_s6 }
 0x1ef   :  { %991 = vsyncpa [#allocation12], 1 }
 0x1f0   :  { %993 = vsyncpa [#allocation12 + $0x1], 1 }
 0x1f1   :  { %994 = vsyncpa [#allocation15], 1 }
 0x1f2   :  { %996 = vsyncpa [#allocation15 + $0x1], 1 }
 0x1f3   :  { %997 = vsyncpa [#allocation13], 1 }
 0x1f4   :  { %999 = vsyncpa [#allocation13 + $0x1], 1 }

</bundles_post_ra>
